<compile_context>
chip_gen: v7x
topology: tpu7x:2x2x1
jax: 0.10.0
libtpu: 0.0.40
codegen_flags: <defaults>
</compile_context>

<pallas_src>
import functools

import jax
import jax.numpy as jnp
from jax.experimental import pallas as pl
from jax.experimental.pallas import tpu as pltpu


_CONV_STRIDES = (2, 1, 1, 1)
_KERNEL = 3
_NUM_FILTERS = 32
_LN_EPS = 1e-5


# ---------------------------------------------------------------------------
# Fused Pallas kernel: conv stack + encoder head + both Q heads in ONE body.
# ---------------------------------------------------------------------------

def _conv3x3_valid_on_grid(x, w_ref, b_ref, gsz):
    """Stride-1 3x3 VALID conv expressed as 9 row-shifted matmuls.

    `x` is (gsz*gsz, Cin) with row index = h*gsz + w (padded spatial grid).
    Tap (i, j) is the activation shifted up by i*gsz + j rows.  Only the
    top-left "valid" region of the output is meaningful; downstream layers only
    ever read valid positions, so garbage in the padded border never
    propagates.  The shifts are sublane moves (XLU); every matmul feeds the MXU
    with the full row tile.
    """
    rows, cin = x.shape
    pad = jnp.zeros((2 * gsz + 2, cin), jnp.float32)
    xp = jnp.concatenate([x, pad], axis=0)                    # (rows + 2*gsz + 2, cin)
    acc = jnp.dot(x, w_ref[0], preferred_element_type=jnp.float32)
    for t in range(1, 9):
        i, j = divmod(t, 3)
        d = i * gsz + j
        acc = acc + jnp.dot(xp[d:d + rows, :], w_ref[t],
                            preferred_element_type=jnp.float32)
    return jnp.maximum(acc + b_ref[...], 0.0)


def _critic_fused_kernel(patches_ref, act_ref,
                         w1_ref, b1_ref,
                         wc2_ref, bc2_ref, wc3_ref, bc3_ref, wc4_ref, bc4_ref,
                         wh_ref, bh_ref, g_ref, beta_ref,
                         wq1f_ref, wq1a_ref, bq1_ref,
                         wq2_ref, bq2_ref, wq3_ref, bq3_ref,
                         q_ref, *, gsz):
    # ---- conv layer 1 (stride 2): the wrapper pre-extracted 3x3 stride-2
    # patches onto the sublane-aligned gsz x gsz output grid, so the conv is a
    # single (gsz*gsz, 9*Cin) @ (9*Cin, 32) matmul.  /255 normalization folded in.
    x = patches_ref[0] * (1.0 / 255.0)
    x = jnp.dot(x, w1_ref[...], preferred_element_type=jnp.float32) + b1_ref[...]
    x = jnp.maximum(x, 0.0)                                   # (gsz*gsz, 32)

    # ---- conv layers 2..4 (stride 1), fully in-kernel (no HBM im2col).
    x = _conv3x3_valid_on_grid(x, wc2_ref, bc2_ref, gsz)
    x = _conv3x3_valid_on_grid(x, wc3_ref, bc3_ref, gsz)
    x = _conv3x3_valid_on_grid(x, wc4_ref, bc4_ref, gsz)

    # Final valid spatial extent is 1x1 -> encoder feature vector is row 0.
    feat = x[0:1, :]                                          # (1, 32)

    # ---- encoder head: Linear -> LayerNorm -> tanh (fused).
    h = jnp.dot(feat, wh_ref[...], preferred_element_type=jnp.float32) + bh_ref[...]
    mu = jnp.mean(h, axis=-1, keepdims=True)
    var = jnp.mean((h - mu) ** 2, axis=-1, keepdims=True)
    h = (h - mu) * jax.lax.rsqrt(var + _LN_EPS)
    h = jnp.tanh(h * g_ref[...] + beta_ref[...])              # (1, feature_dim)

    # ---- double-Q MLP: both heads fused into one chain via stacked /
    # block-diagonal weights (built once at param-pack time).  The
    # concat(feat, action) is folded into two matmuls (no lane concat).
    a = act_ref[0]                                            # (1, action_dim)
    z = (jnp.dot(h, wq1f_ref[...], preferred_element_type=jnp.float32)
         + jnp.dot(a, wq1a_ref[...], preferred_element_type=jnp.float32)
         + bq1_ref[...])
    z = jnp.maximum(z, 0.0)                                   # (1, 2*hidden)
    z = jnp.maximum(jnp.dot(z, wq2_ref[...], preferred_element_type=jnp.float32)
                    + bq2_ref[...], 0.0)
    q = jnp.dot(z, wq3_ref[...], preferred_element_type=jnp.float32) + bq3_ref[...]
    q_ref[0] = q.astype(q_ref.dtype)                          # (1, 2) = [q1, q2]


# ---------------------------------------------------------------------------
# Wrapper: layout plumbing only (transpose, stride-2 patch grid), one launch.
# ---------------------------------------------------------------------------

def _conv1_patches(x_nhwc, gsz):
    """Stride-2 3x3 patch extraction onto a padded gsz x gsz output grid.

    This is the only wrapper-side layout op (the raw obs is tiny); all later
    conv layers do their tap shifts inside the kernel.  Feature order is
    (tap_i, tap_j, channel), matching the packed conv-1 weight.
    """
    b, hgt, wid, c = x_nhwc.shape
    need = 2 * (gsz - 1) + _KERNEL
    xp = jnp.pad(x_nhwc, ((0, 0), (0, max(0, need - hgt)),
                          (0, max(0, need - wid)), (0, 0)))
    cols = []
    for i in range(_KERNEL):
        for j in range(_KERNEL):
            cols.append(xp[:, i:i + 2 * gsz:2, j:j + 2 * gsz:2, :])  # (b, gsz, gsz, c)
    patches = jnp.concatenate(cols, axis=-1)                         # (b, gsz, gsz, 9c)
    return patches.reshape(b, gsz * gsz, _KERNEL * _KERNEL * c)


def _const_spec(shape):
    zeros = (0,) * len(shape)
    return pl.BlockSpec(shape, lambda b, _z=zeros: _z)


def critic_forward(packed, obs, action):
    """Critic.forward: returns (q1, q2), each (B, 1).

    `detach_encoder` only affects gradients in PyTorch; forward values are
    identical, so it has no kernel-side equivalent.
    """
    bsz, _, hgt, wid = obs.shape
    assert action.shape[0] == bsz
    assert hgt == wid

    v = (hgt - _KERNEL) // _CONV_STRIDES[0] + 1     # conv-1 valid output size
    gsz = ((v + 7) // 8) * 8                        # sublane-aligned spatial grid
    vf = v - 2 * (len(_CONV_STRIDES) - 1)           # final valid spatial size
    assert vf == 1, "fused kernel assumes the conv stack reduces spatial to 1x1"

    x = jnp.transpose(obs, (0, 2, 3, 1)).astype(jnp.float32)    # NHWC raw pixels
    patches = _conv1_patches(x, gsz)                            # (B, gsz*gsz, 9*C)
    act3 = action.astype(jnp.float32).reshape(bsz, 1, -1)       # (B, 1, A)

    gg, k1 = patches.shape[1], patches.shape[2]
    adim = act3.shape[2]

    kernel = functools.partial(_critic_fused_kernel, gsz=gsz)
    out = pl.pallas_call(
        kernel,
        grid=(bsz,),
        in_specs=[
            pl.BlockSpec((1, gg, k1), lambda b: (b, 0, 0)),
            pl.BlockSpec((1, 1, adim), lambda b: (b, 0, 0)),
        ] + [_const_spec(tuple(w.shape)) for w in packed],
        out_specs=pl.BlockSpec((1, 1, 2), lambda b: (b, 0, 0)),
        out_shape=jax.ShapeDtypeStruct((bsz, 1, 2), jnp.float32),
        compiler_params=pltpu.CompilerParams(
            dimension_semantics=("parallel",)),      # batch shards across TCs on v7x
    )(patches, act3, *packed)

    q = out.reshape(bsz, 2)
    return q[:, 0:1], q[:, 1:2]


# ---------------------------------------------------------------------------
# Deterministic synthetic parameters (not a checkpoint load) + packing.
# ---------------------------------------------------------------------------

def init_params(key, in_ch, hw, feature_dim, action_dim, hidden_dim):
    """head_w is defined directly against the NHWC-flattened conv output; when
    porting PyTorch (NCHW-flatten) weights, permute its rows once offline."""
    keys = iter(jax.random.split(key, 32))
    nrm = lambda shape, s=0.1: s * jax.random.normal(next(keys), shape, jnp.float32)
    p = {}
    ch = in_ch
    sp = hw
    for l, stride in enumerate(_CONV_STRIDES):
        p[f"conv{l}_w"] = nrm((_KERNEL, _KERNEL, ch, _NUM_FILTERS))     # HWIO
        p[f"conv{l}_b"] = nrm((1, _NUM_FILTERS), 0.05)
        ch = _NUM_FILTERS
        sp = (sp - _KERNEL) // stride + 1
    conv_flat = _NUM_FILTERS * sp * sp
    p["head_w"] = nrm((conv_flat, feature_dim))
    p["head_b"] = nrm((1, feature_dim), 0.05)
    p["ln_g"] = 1.0 + nrm((1, feature_dim))
    p["ln_b"] = nrm((1, feature_dim), 0.05)
    in_dim = feature_dim + action_dim
    for name in ("q1", "q2"):
        p[f"{name}_w1"] = nrm((in_dim, hidden_dim))
        p[f"{name}_b1"] = nrm((1, hidden_dim), 0.05)
        p[f"{name}_w2"] = nrm((hidden_dim, hidden_dim))
        p[f"{name}_b2"] = nrm((1, hidden_dim), 0.05)
        p[f"{name}_w3"] = nrm((hidden_dim, 1))
        p[f"{name}_b3"] = nrm((1, 1), 0.05)
    return p


def pack_params(p):
    """Build the fused-kernel operand tuple (offline weight layout work)."""
    f = p["head_w"].shape[1]
    hid = p["q1_w2"].shape[0]
    w1 = p["conv0_w"].reshape(-1, _NUM_FILTERS)                       # (9*Cin, 32)
    convs = []
    for l in (1, 2, 3):
        convs += [p[f"conv{l}_w"].reshape(_KERNEL * _KERNEL, _NUM_FILTERS, _NUM_FILTERS),
                  p[f"conv{l}_b"]]
    # Double-Q fusion: stack the two heads along the hidden axis.
    wq1f = jnp.concatenate([p["q1_w1"][:f], p["q2_w1"][:f]], axis=1)   # (F, 2H)
    wq1a = jnp.concatenate([p["q1_w1"][f:], p["q2_w1"][f:]], axis=1)   # (A, 2H)
    bq1 = jnp.concatenate([p["q1_b1"], p["q2_b1"]], axis=1)
    wq2 = jnp.zeros((2 * hid, 2 * hid), jnp.float32)
    wq2 = wq2.at[:hid, :hid].set(p["q1_w2"]).at[hid:, hid:].set(p["q2_w2"])
    bq2 = jnp.concatenate([p["q1_b2"], p["q2_b2"]], axis=1)
    wq3 = jnp.zeros((2 * hid, 2), jnp.float32)
    wq3 = wq3.at[:hid, 0:1].set(p["q1_w3"]).at[hid:, 1:2].set(p["q2_w3"])
    bq3 = jnp.concatenate([p["q1_b3"], p["q2_b3"]], axis=1)            # (1, 2)
    return (w1, p["conv0_b"], *convs,
            p["head_w"], p["head_b"], p["ln_g"], p["ln_b"],
            wq1f, wq1a, bq1, wq2, bq2, wq3, bq3)


# ---------------------------------------------------------------------------
# Pure-JAX reference (HIGHEST precision) for the correctness check.
# ---------------------------------------------------------------------------

def critic_forward_ref(p, obs, action):
    hp = jax.lax.Precision.HIGHEST
    x = jnp.transpose(obs, (0, 2, 3, 1)).astype(jnp.float32) * (1.0 / 255.0)
    for l, stride in enumerate(_CONV_STRIDES):
        x = jax.lax.conv_general_dilated(
            x, p[f"conv{l}_w"], window_strides=(stride, stride), padding="VALID",
            dimension_numbers=("NHWC", "HWIO", "NHWC"), precision=hp)
        x = jnp.maximum(x + p[f"conv{l}_b"], 0.0)
    flat = x.reshape(x.shape[0], -1)                  # NHWC flatten (matches head_w)
    h = jnp.dot(flat, p["head_w"], precision=hp) + p["head_b"]
    mu = jnp.mean(h, axis=-1, keepdims=True)
    var = jnp.mean((h - mu) ** 2, axis=-1, keepdims=True)
    h = jnp.tanh((h - mu) * jax.lax.rsqrt(var + _LN_EPS) * p["ln_g"] + p["ln_b"])
    oa = jnp.concatenate([h, action.astype(jnp.float32)], axis=-1)
    qs = []
    for name in ("q1", "q2"):
        z = jnp.maximum(jnp.dot(oa, p[f"{name}_w1"], precision=hp) + p[f"{name}_b1"], 0.0)
        z = jnp.maximum(jnp.dot(z, p[f"{name}_w2"], precision=hp) + p[f"{name}_b2"], 0.0)
        qs.append(jnp.dot(z, p[f"{name}_w3"], precision=hp) + p[f"{name}_b3"])
    return qs[0], qs[1]


# ---------------------------------------------------------------------------

if __name__ == "__main__":
    B, C, H, W = 2, 4, 16, 16        # obs (NCHW pixels)
    ACTION_DIM = 4                   # action_shape = (4,)
    FEATURE_DIM = 32                 # encoder.feature_dim
    HIDDEN_DIM = 32                  # hidden_dim (hidden_depth = 2)

    root = jax.random.PRNGKey(0)
    k_params, k_obs, k_act = jax.random.split(root, 3)

    params = init_params(k_params, C, H, FEATURE_DIM, ACTION_DIM, HIDDEN_DIM)
    packed = pack_params(params)

    obs = jax.random.uniform(k_obs, (B, C, H, W), jnp.float32, minval=0.0, maxval=255.0)
    action = jax.random.uniform(k_act, (B, ACTION_DIM), jnp.float32, minval=-1.0, maxval=1.0)

    q1, q2 = jax.jit(critic_forward)(packed, obs, action)
    jax.block_until_ready((q1, q2))

    # Correctness check against a pure-JAX reference of the PyTorch module.
    r1, r2 = critic_forward_ref(params, obs, action)

    assert q1.shape == (B, 1) and q2.shape == (B, 1)
    assert bool(jnp.all(jnp.isfinite(q1))) and bool(jnp.all(jnp.isfinite(q2)))
    assert bool(jnp.allclose(q1, r1, atol=2e-2, rtol=2e-2))
    assert bool(jnp.allclose(q2, r2, atol=2e-2, rtol=2e-2))
    print("KERNEL_OK")
</pallas_src>

<mosaic_0001>
module attributes {stable_mosaic.version = 11 : i64} {
  func.func @_critic_fused_kernel(%arg0: i32, %arg1: memref<1x64x36xf32, #tpu.memory_space<vmem>>, %arg2: memref<1x1x4xf32, #tpu.memory_space<vmem>>, %arg3: memref<36x32xf32, #tpu.memory_space<vmem>>, %arg4: memref<1x32xf32, #tpu.memory_space<vmem>>, %arg5: memref<9x32x32xf32, #tpu.memory_space<vmem>>, %arg6: memref<1x32xf32, #tpu.memory_space<vmem>>, %arg7: memref<9x32x32xf32, #tpu.memory_space<vmem>>, %arg8: memref<1x32xf32, #tpu.memory_space<vmem>>, %arg9: memref<9x32x32xf32, #tpu.memory_space<vmem>>, %arg10: memref<1x32xf32, #tpu.memory_space<vmem>>, %arg11: memref<32x32xf32, #tpu.memory_space<vmem>>, %arg12: memref<1x32xf32, #tpu.memory_space<vmem>>, %arg13: memref<1x32xf32, #tpu.memory_space<vmem>>, %arg14: memref<1x32xf32, #tpu.memory_space<vmem>>, %arg15: memref<32x64xf32, #tpu.memory_space<vmem>>, %arg16: memref<4x64xf32, #tpu.memory_space<vmem>>, %arg17: memref<1x64xf32, #tpu.memory_space<vmem>>, %arg18: memref<64x64xf32, #tpu.memory_space<vmem>>, %arg19: memref<1x64xf32, #tpu.memory_space<vmem>>, %arg20: memref<64x2xf32, #tpu.memory_space<vmem>>, %arg21: memref<1x2xf32, #tpu.memory_space<vmem>>, %arg22: memref<1x1x2xf32, #tpu.memory_space<vmem>>) attributes {dimension_semantics = [#tpu.dimension_semantics<parallel>], iteration_bounds = array<i64: 2>, scalar_prefetch = 0 : i64, scratch_operands = 0 : i64, tpu.core_type = #tpu.core_type<tc>, window_params = [{transform_indices = @transform_0, window_bounds = array<i64: 1, 64, 36>}, {transform_indices = @transform_1, window_bounds = array<i64: 1, 1, 4>}, {pipeline_mode = #tpu.pipeline_mode<synchronous>, transform_indices = @transform_2, window_bounds = array<i64: 36, 32>}, {pipeline_mode = #tpu.pipeline_mode<synchronous>, transform_indices = @transform_3, window_bounds = array<i64: 1, 32>}, {pipeline_mode = #tpu.pipeline_mode<synchronous>, transform_indices = @transform_4, window_bounds = array<i64: 9, 32, 32>}, {pipeline_mode = #tpu.pipeline_mode<synchronous>, transform_indices = @transform_5, window_bounds = array<i64: 1, 32>}, {pipeline_mode = #tpu.pipeline_mode<synchronous>, transform_indices = @transform_6, window_bounds = array<i64: 9, 32, 32>}, {pipeline_mode = #tpu.pipeline_mode<synchronous>, transform_indices = @transform_7, window_bounds = array<i64: 1, 32>}, {pipeline_mode = #tpu.pipeline_mode<synchronous>, transform_indices = @transform_8, window_bounds = array<i64: 9, 32, 32>}, {pipeline_mode = #tpu.pipeline_mode<synchronous>, transform_indices = @transform_9, window_bounds = array<i64: 1, 32>}, {pipeline_mode = #tpu.pipeline_mode<synchronous>, transform_indices = @transform_10, window_bounds = array<i64: 32, 32>}, {pipeline_mode = #tpu.pipeline_mode<synchronous>, transform_indices = @transform_11, window_bounds = array<i64: 1, 32>}, {pipeline_mode = #tpu.pipeline_mode<synchronous>, transform_indices = @transform_12, window_bounds = array<i64: 1, 32>}, {pipeline_mode = #tpu.pipeline_mode<synchronous>, transform_indices = @transform_13, window_bounds = array<i64: 1, 32>}, {pipeline_mode = #tpu.pipeline_mode<synchronous>, transform_indices = @transform_14, window_bounds = array<i64: 32, 64>}, {pipeline_mode = #tpu.pipeline_mode<synchronous>, transform_indices = @transform_15, window_bounds = array<i64: 4, 64>}, {pipeline_mode = #tpu.pipeline_mode<synchronous>, transform_indices = @transform_16, window_bounds = array<i64: 1, 64>}, {pipeline_mode = #tpu.pipeline_mode<synchronous>, transform_indices = @transform_17, window_bounds = array<i64: 64, 64>}, {pipeline_mode = #tpu.pipeline_mode<synchronous>, transform_indices = @transform_18, window_bounds = array<i64: 1, 64>}, {pipeline_mode = #tpu.pipeline_mode<synchronous>, transform_indices = @transform_19, window_bounds = array<i64: 64, 2>}, {pipeline_mode = #tpu.pipeline_mode<synchronous>, transform_indices = @transform_20, window_bounds = array<i64: 1, 2>}, {transform_indices = @transform_21, window_bounds = array<i64: 1, 1, 2>}]} {
    %c0 = arith.constant 0 : index
    %c0_0 = arith.constant 0 : index
    %c0_1 = arith.constant 0 : index
    %0 = vector.load %arg1[%c0, %c0_0, %c0_1] : memref<1x64x36xf32, #tpu.memory_space<vmem>>, vector<1x64x36xf32>
    %1 = vector.shape_cast %0 : vector<1x64x36xf32> to vector<64x36xf32>
    %cst = arith.constant 0.00392156886 : f32
    %2 = vector.broadcast %cst : f32 to vector<64x36xf32>
    %3 = arith.mulf %1, %2 : vector<64x36xf32>
    %c0_2 = arith.constant 0 : index
    %c0_3 = arith.constant 0 : index
    %4 = vector.load %arg3[%c0_2, %c0_3] : memref<36x32xf32, #tpu.memory_space<vmem>>, vector<36x32xf32>
    %cst_4 = arith.constant dense<0.000000e+00> : vector<64x32xf32>
    %5 = tpu.matmul %3, %4, %cst_4 {dimension_numbers = #tpu.dot_dimension_numbers<[1], [0], [0], [1], [0, 0, 1, 1], [], []>} : vector<64x36xf32>, vector<36x32xf32>, vector<64x32xf32> -> vector<64x32xf32>
    %c0_5 = arith.constant 0 : index
    %c0_6 = arith.constant 0 : index
    %6 = vector.load %arg4[%c0_5, %c0_6] : memref<1x32xf32, #tpu.memory_space<vmem>>, vector<1x32xf32>
    %7 = vector.broadcast %6 : vector<1x32xf32> to vector<64x32xf32>
    %8 = arith.addf %5, %7 : vector<64x32xf32>
    %cst_7 = arith.constant 0.000000e+00 : f32
    %9 = vector.broadcast %cst_7 : f32 to vector<64x32xf32>
    %10 = arith.maximumf %8, %9 : vector<64x32xf32>
    %cst_8 = arith.constant 0.000000e+00 : f32
    %11 = vector.broadcast %cst_8 : f32 to vector<18x32xf32>
    %12 = tpu.concatenate %10, %11 in 0 : vector<64x32xf32>, vector<18x32xf32> -> vector<82x32xf32>
    %c0_9 = arith.constant 0 : index
    %c0_10 = arith.constant 0 : index
    %c0_11 = arith.constant 0 : index
    %13 = vector.load %arg5[%c0_9, %c0_10, %c0_11] : memref<9x32x32xf32, #tpu.memory_space<vmem>>, vector<1x32x32xf32>
    %14 = vector.shape_cast %13 : vector<1x32x32xf32> to vector<32x32xf32>
    %cst_12 = arith.constant dense<0.000000e+00> : vector<64x32xf32>
    %15 = tpu.matmul %10, %14, %cst_12 {dimension_numbers = #tpu.dot_dimension_numbers<[1], [0], [0], [1], [0, 0, 1, 1], [], []>} : vector<64x32xf32>, vector<32x32xf32>, vector<64x32xf32> -> vector<64x32xf32>
    %16 = vector.extract_strided_slice %12 {offsets = [1, 0], sizes = [64, 32], strides = [1, 1]} : vector<82x32xf32> to vector<64x32xf32>
    %c1 = arith.constant 1 : index
    %c0_13 = arith.constant 0 : index
    %c0_14 = arith.constant 0 : index
    %17 = vector.load %arg5[%c1, %c0_13, %c0_14] : memref<9x32x32xf32, #tpu.memory_space<vmem>>, vector<1x32x32xf32>
    %18 = vector.shape_cast %17 : vector<1x32x32xf32> to vector<32x32xf32>
    %cst_15 = arith.constant dense<0.000000e+00> : vector<64x32xf32>
    %19 = tpu.matmul %16, %18, %cst_15 {dimension_numbers = #tpu.dot_dimension_numbers<[1], [0], [0], [1], [0, 0, 1, 1], [], []>} : vector<64x32xf32>, vector<32x32xf32>, vector<64x32xf32> -> vector<64x32xf32>
    %20 = arith.addf %15, %19 : vector<64x32xf32>
    %21 = vector.extract_strided_slice %12 {offsets = [2, 0], sizes = [64, 32], strides = [1, 1]} : vector<82x32xf32> to vector<64x32xf32>
    %c2 = arith.constant 2 : index
    %c0_16 = arith.constant 0 : index
    %c0_17 = arith.constant 0 : index
    %22 = vector.load %arg5[%c2, %c0_16, %c0_17] : memref<9x32x32xf32, #tpu.memory_space<vmem>>, vector<1x32x32xf32>
    %23 = vector.shape_cast %22 : vector<1x32x32xf32> to vector<32x32xf32>
    %cst_18 = arith.constant dense<0.000000e+00> : vector<64x32xf32>
    %24 = tpu.matmul %21, %23, %cst_18 {dimension_numbers = #tpu.dot_dimension_numbers<[1], [0], [0], [1], [0, 0, 1, 1], [], []>} : vector<64x32xf32>, vector<32x32xf32>, vector<64x32xf32> -> vector<64x32xf32>
    %25 = arith.addf %20, %24 : vector<64x32xf32>
    %26 = vector.extract_strided_slice %12 {offsets = [8, 0], sizes = [64, 32], strides = [1, 1]} : vector<82x32xf32> to vector<64x32xf32>
    %c3 = arith.constant 3 : index
    %c0_19 = arith.constant 0 : index
    %c0_20 = arith.constant 0 : index
    %27 = vector.load %arg5[%c3, %c0_19, %c0_20] : memref<9x32x32xf32, #tpu.memory_space<vmem>>, vector<1x32x32xf32>
    %28 = vector.shape_cast %27 : vector<1x32x32xf32> to vector<32x32xf32>
    %cst_21 = arith.constant dense<0.000000e+00> : vector<64x32xf32>
    %29 = tpu.matmul %26, %28, %cst_21 {dimension_numbers = #tpu.dot_dimension_numbers<[1], [0], [0], [1], [0, 0, 1, 1], [], []>} : vector<64x32xf32>, vector<32x32xf32>, vector<64x32xf32> -> vector<64x32xf32>
    %30 = arith.addf %25, %29 : vector<64x32xf32>
    %31 = vector.extract_strided_slice %12 {offsets = [9, 0], sizes = [64, 32], strides = [1, 1]} : vector<82x32xf32> to vector<64x32xf32>
    %c4 = arith.constant 4 : index
    %c0_22 = arith.constant 0 : index
    %c0_23 = arith.constant 0 : index
    %32 = vector.load %arg5[%c4, %c0_22, %c0_23] : memref<9x32x32xf32, #tpu.memory_space<vmem>>, vector<1x32x32xf32>
    %33 = vector.shape_cast %32 : vector<1x32x32xf32> to vector<32x32xf32>
    %cst_24 = arith.constant dense<0.000000e+00> : vector<64x32xf32>
    %34 = tpu.matmul %31, %33, %cst_24 {dimension_numbers = #tpu.dot_dimension_numbers<[1], [0], [0], [1], [0, 0, 1, 1], [], []>} : vector<64x32xf32>, vector<32x32xf32>, vector<64x32xf32> -> vector<64x32xf32>
    %35 = arith.addf %30, %34 : vector<64x32xf32>
    %36 = vector.extract_strided_slice %12 {offsets = [10, 0], sizes = [64, 32], strides = [1, 1]} : vector<82x32xf32> to vector<64x32xf32>
    %c5 = arith.constant 5 : index
    %c0_25 = arith.constant 0 : index
    %c0_26 = arith.constant 0 : index
    %37 = vector.load %arg5[%c5, %c0_25, %c0_26] : memref<9x32x32xf32, #tpu.memory_space<vmem>>, vector<1x32x32xf32>
    %38 = vector.shape_cast %37 : vector<1x32x32xf32> to vector<32x32xf32>
    %cst_27 = arith.constant dense<0.000000e+00> : vector<64x32xf32>
    %39 = tpu.matmul %36, %38, %cst_27 {dimension_numbers = #tpu.dot_dimension_numbers<[1], [0], [0], [1], [0, 0, 1, 1], [], []>} : vector<64x32xf32>, vector<32x32xf32>, vector<64x32xf32> -> vector<64x32xf32>
    %40 = arith.addf %35, %39 : vector<64x32xf32>
    %41 = vector.extract_strided_slice %12 {offsets = [16, 0], sizes = [64, 32], strides = [1, 1]} : vector<82x32xf32> to vector<64x32xf32>
    %c6 = arith.constant 6 : index
    %c0_28 = arith.constant 0 : index
    %c0_29 = arith.constant 0 : index
    %42 = vector.load %arg5[%c6, %c0_28, %c0_29] : memref<9x32x32xf32, #tpu.memory_space<vmem>>, vector<1x32x32xf32>
    %43 = vector.shape_cast %42 : vector<1x32x32xf32> to vector<32x32xf32>
    %cst_30 = arith.constant dense<0.000000e+00> : vector<64x32xf32>
    %44 = tpu.matmul %41, %43, %cst_30 {dimension_numbers = #tpu.dot_dimension_numbers<[1], [0], [0], [1], [0, 0, 1, 1], [], []>} : vector<64x32xf32>, vector<32x32xf32>, vector<64x32xf32> -> vector<64x32xf32>
    %45 = arith.addf %40, %44 : vector<64x32xf32>
    %46 = vector.extract_strided_slice %12 {offsets = [17, 0], sizes = [64, 32], strides = [1, 1]} : vector<82x32xf32> to vector<64x32xf32>
    %c7 = arith.constant 7 : index
    %c0_31 = arith.constant 0 : index
    %c0_32 = arith.constant 0 : index
    %47 = vector.load %arg5[%c7, %c0_31, %c0_32] : memref<9x32x32xf32, #tpu.memory_space<vmem>>, vector<1x32x32xf32>
    %48 = vector.shape_cast %47 : vector<1x32x32xf32> to vector<32x32xf32>
    %cst_33 = arith.constant dense<0.000000e+00> : vector<64x32xf32>
    %49 = tpu.matmul %46, %48, %cst_33 {dimension_numbers = #tpu.dot_dimension_numbers<[1], [0], [0], [1], [0, 0, 1, 1], [], []>} : vector<64x32xf32>, vector<32x32xf32>, vector<64x32xf32> -> vector<64x32xf32>
    %50 = arith.addf %45, %49 : vector<64x32xf32>
    %51 = vector.extract_strided_slice %12 {offsets = [18, 0], sizes = [64, 32], strides = [1, 1]} : vector<82x32xf32> to vector<64x32xf32>
    %c8 = arith.constant 8 : index
    %c0_34 = arith.constant 0 : index
    %c0_35 = arith.constant 0 : index
    %52 = vector.load %arg5[%c8, %c0_34, %c0_35] : memref<9x32x32xf32, #tpu.memory_space<vmem>>, vector<1x32x32xf32>
    %53 = vector.shape_cast %52 : vector<1x32x32xf32> to vector<32x32xf32>
    %cst_36 = arith.constant dense<0.000000e+00> : vector<64x32xf32>
    %54 = tpu.matmul %51, %53, %cst_36 {dimension_numbers = #tpu.dot_dimension_numbers<[1], [0], [0], [1], [0, 0, 1, 1], [], []>} : vector<64x32xf32>, vector<32x32xf32>, vector<64x32xf32> -> vector<64x32xf32>
    %55 = arith.addf %50, %54 : vector<64x32xf32>
    %c0_37 = arith.constant 0 : index
    %c0_38 = arith.constant 0 : index
    %56 = vector.load %arg6[%c0_37, %c0_38] : memref<1x32xf32, #tpu.memory_space<vmem>>, vector<1x32xf32>
    %57 = vector.broadcast %56 : vector<1x32xf32> to vector<64x32xf32>
    %58 = arith.addf %55, %57 : vector<64x32xf32>
    %cst_39 = arith.constant 0.000000e+00 : f32
    %59 = vector.broadcast %cst_39 : f32 to vector<64x32xf32>
    %60 = arith.maximumf %58, %59 : vector<64x32xf32>
    %cst_40 = arith.constant 0.000000e+00 : f32
    %61 = vector.broadcast %cst_40 : f32 to vector<18x32xf32>
    %62 = tpu.concatenate %60, %61 in 0 : vector<64x32xf32>, vector<18x32xf32> -> vector<82x32xf32>
    %c0_41 = arith.constant 0 : index
    %c0_42 = arith.constant 0 : index
    %c0_43 = arith.constant 0 : index
    %63 = vector.load %arg7[%c0_41, %c0_42, %c0_43] : memref<9x32x32xf32, #tpu.memory_space<vmem>>, vector<1x32x32xf32>
    %64 = vector.shape_cast %63 : vector<1x32x32xf32> to vector<32x32xf32>
    %cst_44 = arith.constant dense<0.000000e+00> : vector<64x32xf32>
    %65 = tpu.matmul %60, %64, %cst_44 {dimension_numbers = #tpu.dot_dimension_numbers<[1], [0], [0], [1], [0, 0, 1, 1], [], []>} : vector<64x32xf32>, vector<32x32xf32>, vector<64x32xf32> -> vector<64x32xf32>
    %66 = vector.extract_strided_slice %62 {offsets = [1, 0], sizes = [64, 32], strides = [1, 1]} : vector<82x32xf32> to vector<64x32xf32>
    %c1_45 = arith.constant 1 : index
    %c0_46 = arith.constant 0 : index
    %c0_47 = arith.constant 0 : index
    %67 = vector.load %arg7[%c1_45, %c0_46, %c0_47] : memref<9x32x32xf32, #tpu.memory_space<vmem>>, vector<1x32x32xf32>
    %68 = vector.shape_cast %67 : vector<1x32x32xf32> to vector<32x32xf32>
    %cst_48 = arith.constant dense<0.000000e+00> : vector<64x32xf32>
    %69 = tpu.matmul %66, %68, %cst_48 {dimension_numbers = #tpu.dot_dimension_numbers<[1], [0], [0], [1], [0, 0, 1, 1], [], []>} : vector<64x32xf32>, vector<32x32xf32>, vector<64x32xf32> -> vector<64x32xf32>
    %70 = arith.addf %65, %69 : vector<64x32xf32>
    %71 = vector.extract_strided_slice %62 {offsets = [2, 0], sizes = [64, 32], strides = [1, 1]} : vector<82x32xf32> to vector<64x32xf32>
    %c2_49 = arith.constant 2 : index
    %c0_50 = arith.constant 0 : index
    %c0_51 = arith.constant 0 : index
    %72 = vector.load %arg7[%c2_49, %c0_50, %c0_51] : memref<9x32x32xf32, #tpu.memory_space<vmem>>, vector<1x32x32xf32>
    %73 = vector.shape_cast %72 : vector<1x32x32xf32> to vector<32x32xf32>
    %cst_52 = arith.constant dense<0.000000e+00> : vector<64x32xf32>
    %74 = tpu.matmul %71, %73, %cst_52 {dimension_numbers = #tpu.dot_dimension_numbers<[1], [0], [0], [1], [0, 0, 1, 1], [], []>} : vector<64x32xf32>, vector<32x32xf32>, vector<64x32xf32> -> vector<64x32xf32>
    %75 = arith.addf %70, %74 : vector<64x32xf32>
    %76 = vector.extract_strided_slice %62 {offsets = [8, 0], sizes = [64, 32], strides = [1, 1]} : vector<82x32xf32> to vector<64x32xf32>
    %c3_53 = arith.constant 3 : index
    %c0_54 = arith.constant 0 : index
    %c0_55 = arith.constant 0 : index
    %77 = vector.load %arg7[%c3_53, %c0_54, %c0_55] : memref<9x32x32xf32, #tpu.memory_space<vmem>>, vector<1x32x32xf32>
    %78 = vector.shape_cast %77 : vector<1x32x32xf32> to vector<32x32xf32>
    %cst_56 = arith.constant dense<0.000000e+00> : vector<64x32xf32>
    %79 = tpu.matmul %76, %78, %cst_56 {dimension_numbers = #tpu.dot_dimension_numbers<[1], [0], [0], [1], [0, 0, 1, 1], [], []>} : vector<64x32xf32>, vector<32x32xf32>, vector<64x32xf32> -> vector<64x32xf32>
    %80 = arith.addf %75, %79 : vector<64x32xf32>
    %81 = vector.extract_strided_slice %62 {offsets = [9, 0], sizes = [64, 32], strides = [1, 1]} : vector<82x32xf32> to vector<64x32xf32>
    %c4_57 = arith.constant 4 : index
    %c0_58 = arith.constant 0 : index
    %c0_59 = arith.constant 0 : index
    %82 = vector.load %arg7[%c4_57, %c0_58, %c0_59] : memref<9x32x32xf32, #tpu.memory_space<vmem>>, vector<1x32x32xf32>
    %83 = vector.shape_cast %82 : vector<1x32x32xf32> to vector<32x32xf32>
    %cst_60 = arith.constant dense<0.000000e+00> : vector<64x32xf32>
    %84 = tpu.matmul %81, %83, %cst_60 {dimension_numbers = #tpu.dot_dimension_numbers<[1], [0], [0], [1], [0, 0, 1, 1], [], []>} : vector<64x32xf32>, vector<32x32xf32>, vector<64x32xf32> -> vector<64x32xf32>
    %85 = arith.addf %80, %84 : vector<64x32xf32>
    %86 = vector.extract_strided_slice %62 {offsets = [10, 0], sizes = [64, 32], strides = [1, 1]} : vector<82x32xf32> to vector<64x32xf32>
    %c5_61 = arith.constant 5 : index
    %c0_62 = arith.constant 0 : index
    %c0_63 = arith.constant 0 : index
    %87 = vector.load %arg7[%c5_61, %c0_62, %c0_63] : memref<9x32x32xf32, #tpu.memory_space<vmem>>, vector<1x32x32xf32>
    %88 = vector.shape_cast %87 : vector<1x32x32xf32> to vector<32x32xf32>
    %cst_64 = arith.constant dense<0.000000e+00> : vector<64x32xf32>
    %89 = tpu.matmul %86, %88, %cst_64 {dimension_numbers = #tpu.dot_dimension_numbers<[1], [0], [0], [1], [0, 0, 1, 1], [], []>} : vector<64x32xf32>, vector<32x32xf32>, vector<64x32xf32> -> vector<64x32xf32>
    %90 = arith.addf %85, %89 : vector<64x32xf32>
    %91 = vector.extract_strided_slice %62 {offsets = [16, 0], sizes = [64, 32], strides = [1, 1]} : vector<82x32xf32> to vector<64x32xf32>
    %c6_65 = arith.constant 6 : index
    %c0_66 = arith.constant 0 : index
    %c0_67 = arith.constant 0 : index
    %92 = vector.load %arg7[%c6_65, %c0_66, %c0_67] : memref<9x32x32xf32, #tpu.memory_space<vmem>>, vector<1x32x32xf32>
    %93 = vector.shape_cast %92 : vector<1x32x32xf32> to vector<32x32xf32>
    %cst_68 = arith.constant dense<0.000000e+00> : vector<64x32xf32>
    %94 = tpu.matmul %91, %93, %cst_68 {dimension_numbers = #tpu.dot_dimension_numbers<[1], [0], [0], [1], [0, 0, 1, 1], [], []>} : vector<64x32xf32>, vector<32x32xf32>, vector<64x32xf32> -> vector<64x32xf32>
    %95 = arith.addf %90, %94 : vector<64x32xf32>
    %96 = vector.extract_strided_slice %62 {offsets = [17, 0], sizes = [64, 32], strides = [1, 1]} : vector<82x32xf32> to vector<64x32xf32>
    %c7_69 = arith.constant 7 : index
    %c0_70 = arith.constant 0 : index
    %c0_71 = arith.constant 0 : index
    %97 = vector.load %arg7[%c7_69, %c0_70, %c0_71] : memref<9x32x32xf32, #tpu.memory_space<vmem>>, vector<1x32x32xf32>
    %98 = vector.shape_cast %97 : vector<1x32x32xf32> to vector<32x32xf32>
    %cst_72 = arith.constant dense<0.000000e+00> : vector<64x32xf32>
    %99 = tpu.matmul %96, %98, %cst_72 {dimension_numbers = #tpu.dot_dimension_numbers<[1], [0], [0], [1], [0, 0, 1, 1], [], []>} : vector<64x32xf32>, vector<32x32xf32>, vector<64x32xf32> -> vector<64x32xf32>
    %100 = arith.addf %95, %99 : vector<64x32xf32>
    %101 = vector.extract_strided_slice %62 {offsets = [18, 0], sizes = [64, 32], strides = [1, 1]} : vector<82x32xf32> to vector<64x32xf32>
    %c8_73 = arith.constant 8 : index
    %c0_74 = arith.constant 0 : index
    %c0_75 = arith.constant 0 : index
    %102 = vector.load %arg7[%c8_73, %c0_74, %c0_75] : memref<9x32x32xf32, #tpu.memory_space<vmem>>, vector<1x32x32xf32>
    %103 = vector.shape_cast %102 : vector<1x32x32xf32> to vector<32x32xf32>
    %cst_76 = arith.constant dense<0.000000e+00> : vector<64x32xf32>
    %104 = tpu.matmul %101, %103, %cst_76 {dimension_numbers = #tpu.dot_dimension_numbers<[1], [0], [0], [1], [0, 0, 1, 1], [], []>} : vector<64x32xf32>, vector<32x32xf32>, vector<64x32xf32> -> vector<64x32xf32>
    %105 = arith.addf %100, %104 : vector<64x32xf32>
    %c0_77 = arith.constant 0 : index
    %c0_78 = arith.constant 0 : index
    %106 = vector.load %arg8[%c0_77, %c0_78] : memref<1x32xf32, #tpu.memory_space<vmem>>, vector<1x32xf32>
    %107 = vector.broadcast %106 : vector<1x32xf32> to vector<64x32xf32>
    %108 = arith.addf %105, %107 : vector<64x32xf32>
    %cst_79 = arith.constant 0.000000e+00 : f32
    %109 = vector.broadcast %cst_79 : f32 to vector<64x32xf32>
    %110 = arith.maximumf %108, %109 : vector<64x32xf32>
    %cst_80 = arith.constant 0.000000e+00 : f32
    %111 = vector.broadcast %cst_80 : f32 to vector<18x32xf32>
    %112 = tpu.concatenate %110, %111 in 0 : vector<64x32xf32>, vector<18x32xf32> -> vector<82x32xf32>
    %c0_81 = arith.constant 0 : index
    %c0_82 = arith.constant 0 : index
    %c0_83 = arith.constant 0 : index
    %113 = vector.load %arg9[%c0_81, %c0_82, %c0_83] : memref<9x32x32xf32, #tpu.memory_space<vmem>>, vector<1x32x32xf32>
    %114 = vector.shape_cast %113 : vector<1x32x32xf32> to vector<32x32xf32>
    %cst_84 = arith.constant dense<0.000000e+00> : vector<64x32xf32>
    %115 = tpu.matmul %110, %114, %cst_84 {dimension_numbers = #tpu.dot_dimension_numbers<[1], [0], [0], [1], [0, 0, 1, 1], [], []>} : vector<64x32xf32>, vector<32x32xf32>, vector<64x32xf32> -> vector<64x32xf32>
    %116 = vector.extract_strided_slice %112 {offsets = [1, 0], sizes = [64, 32], strides = [1, 1]} : vector<82x32xf32> to vector<64x32xf32>
    %c1_85 = arith.constant 1 : index
    %c0_86 = arith.constant 0 : index
    %c0_87 = arith.constant 0 : index
    %117 = vector.load %arg9[%c1_85, %c0_86, %c0_87] : memref<9x32x32xf32, #tpu.memory_space<vmem>>, vector<1x32x32xf32>
    %118 = vector.shape_cast %117 : vector<1x32x32xf32> to vector<32x32xf32>
    %cst_88 = arith.constant dense<0.000000e+00> : vector<64x32xf32>
    %119 = tpu.matmul %116, %118, %cst_88 {dimension_numbers = #tpu.dot_dimension_numbers<[1], [0], [0], [1], [0, 0, 1, 1], [], []>} : vector<64x32xf32>, vector<32x32xf32>, vector<64x32xf32> -> vector<64x32xf32>
    %120 = arith.addf %115, %119 : vector<64x32xf32>
    %121 = vector.extract_strided_slice %112 {offsets = [2, 0], sizes = [64, 32], strides = [1, 1]} : vector<82x32xf32> to vector<64x32xf32>
    %c2_89 = arith.constant 2 : index
    %c0_90 = arith.constant 0 : index
    %c0_91 = arith.constant 0 : index
    %122 = vector.load %arg9[%c2_89, %c0_90, %c0_91] : memref<9x32x32xf32, #tpu.memory_space<vmem>>, vector<1x32x32xf32>
    %123 = vector.shape_cast %122 : vector<1x32x32xf32> to vector<32x32xf32>
    %cst_92 = arith.constant dense<0.000000e+00> : vector<64x32xf32>
    %124 = tpu.matmul %121, %123, %cst_92 {dimension_numbers = #tpu.dot_dimension_numbers<[1], [0], [0], [1], [0, 0, 1, 1], [], []>} : vector<64x32xf32>, vector<32x32xf32>, vector<64x32xf32> -> vector<64x32xf32>
    %125 = arith.addf %120, %124 : vector<64x32xf32>
    %126 = vector.extract_strided_slice %112 {offsets = [8, 0], sizes = [64, 32], strides = [1, 1]} : vector<82x32xf32> to vector<64x32xf32>
    %c3_93 = arith.constant 3 : index
    %c0_94 = arith.constant 0 : index
    %c0_95 = arith.constant 0 : index
    %127 = vector.load %arg9[%c3_93, %c0_94, %c0_95] : memref<9x32x32xf32, #tpu.memory_space<vmem>>, vector<1x32x32xf32>
    %128 = vector.shape_cast %127 : vector<1x32x32xf32> to vector<32x32xf32>
    %cst_96 = arith.constant dense<0.000000e+00> : vector<64x32xf32>
    %129 = tpu.matmul %126, %128, %cst_96 {dimension_numbers = #tpu.dot_dimension_numbers<[1], [0], [0], [1], [0, 0, 1, 1], [], []>} : vector<64x32xf32>, vector<32x32xf32>, vector<64x32xf32> -> vector<64x32xf32>
    %130 = arith.addf %125, %129 : vector<64x32xf32>
    %131 = vector.extract_strided_slice %112 {offsets = [9, 0], sizes = [64, 32], strides = [1, 1]} : vector<82x32xf32> to vector<64x32xf32>
    %c4_97 = arith.constant 4 : index
    %c0_98 = arith.constant 0 : index
    %c0_99 = arith.constant 0 : index
    %132 = vector.load %arg9[%c4_97, %c0_98, %c0_99] : memref<9x32x32xf32, #tpu.memory_space<vmem>>, vector<1x32x32xf32>
    %133 = vector.shape_cast %132 : vector<1x32x32xf32> to vector<32x32xf32>
    %cst_100 = arith.constant dense<0.000000e+00> : vector<64x32xf32>
    %134 = tpu.matmul %131, %133, %cst_100 {dimension_numbers = #tpu.dot_dimension_numbers<[1], [0], [0], [1], [0, 0, 1, 1], [], []>} : vector<64x32xf32>, vector<32x32xf32>, vector<64x32xf32> -> vector<64x32xf32>
    %135 = arith.addf %130, %134 : vector<64x32xf32>
    %136 = vector.extract_strided_slice %112 {offsets = [10, 0], sizes = [64, 32], strides = [1, 1]} : vector<82x32xf32> to vector<64x32xf32>
    %c5_101 = arith.constant 5 : index
    %c0_102 = arith.constant 0 : index
    %c0_103 = arith.constant 0 : index
    %137 = vector.load %arg9[%c5_101, %c0_102, %c0_103] : memref<9x32x32xf32, #tpu.memory_space<vmem>>, vector<1x32x32xf32>
    %138 = vector.shape_cast %137 : vector<1x32x32xf32> to vector<32x32xf32>
    %cst_104 = arith.constant dense<0.000000e+00> : vector<64x32xf32>
    %139 = tpu.matmul %136, %138, %cst_104 {dimension_numbers = #tpu.dot_dimension_numbers<[1], [0], [0], [1], [0, 0, 1, 1], [], []>} : vector<64x32xf32>, vector<32x32xf32>, vector<64x32xf32> -> vector<64x32xf32>
    %140 = arith.addf %135, %139 : vector<64x32xf32>
    %141 = vector.extract_strided_slice %112 {offsets = [16, 0], sizes = [64, 32], strides = [1, 1]} : vector<82x32xf32> to vector<64x32xf32>
    %c6_105 = arith.constant 6 : index
    %c0_106 = arith.constant 0 : index
    %c0_107 = arith.constant 0 : index
    %142 = vector.load %arg9[%c6_105, %c0_106, %c0_107] : memref<9x32x32xf32, #tpu.memory_space<vmem>>, vector<1x32x32xf32>
    %143 = vector.shape_cast %142 : vector<1x32x32xf32> to vector<32x32xf32>
    %cst_108 = arith.constant dense<0.000000e+00> : vector<64x32xf32>
    %144 = tpu.matmul %141, %143, %cst_108 {dimension_numbers = #tpu.dot_dimension_numbers<[1], [0], [0], [1], [0, 0, 1, 1], [], []>} : vector<64x32xf32>, vector<32x32xf32>, vector<64x32xf32> -> vector<64x32xf32>
    %145 = arith.addf %140, %144 : vector<64x32xf32>
    %146 = vector.extract_strided_slice %112 {offsets = [17, 0], sizes = [64, 32], strides = [1, 1]} : vector<82x32xf32> to vector<64x32xf32>
    %c7_109 = arith.constant 7 : index
    %c0_110 = arith.constant 0 : index
    %c0_111 = arith.constant 0 : index
    %147 = vector.load %arg9[%c7_109, %c0_110, %c0_111] : memref<9x32x32xf32, #tpu.memory_space<vmem>>, vector<1x32x32xf32>
    %148 = vector.shape_cast %147 : vector<1x32x32xf32> to vector<32x32xf32>
    %cst_112 = arith.constant dense<0.000000e+00> : vector<64x32xf32>
    %149 = tpu.matmul %146, %148, %cst_112 {dimension_numbers = #tpu.dot_dimension_numbers<[1], [0], [0], [1], [0, 0, 1, 1], [], []>} : vector<64x32xf32>, vector<32x32xf32>, vector<64x32xf32> -> vector<64x32xf32>
    %150 = arith.addf %145, %149 : vector<64x32xf32>
    %151 = vector.extract_strided_slice %112 {offsets = [18, 0], sizes = [64, 32], strides = [1, 1]} : vector<82x32xf32> to vector<64x32xf32>
    %c8_113 = arith.constant 8 : index
    %c0_114 = arith.constant 0 : index
    %c0_115 = arith.constant 0 : index
    %152 = vector.load %arg9[%c8_113, %c0_114, %c0_115] : memref<9x32x32xf32, #tpu.memory_space<vmem>>, vector<1x32x32xf32>
    %153 = vector.shape_cast %152 : vector<1x32x32xf32> to vector<32x32xf32>
    %cst_116 = arith.constant dense<0.000000e+00> : vector<64x32xf32>
    %154 = tpu.matmul %151, %153, %cst_116 {dimension_numbers = #tpu.dot_dimension_numbers<[1], [0], [0], [1], [0, 0, 1, 1], [], []>} : vector<64x32xf32>, vector<32x32xf32>, vector<64x32xf32> -> vector<64x32xf32>
    %155 = arith.addf %150, %154 : vector<64x32xf32>
    %c0_117 = arith.constant 0 : index
    %c0_118 = arith.constant 0 : index
    %156 = vector.load %arg10[%c0_117, %c0_118] : memref<1x32xf32, #tpu.memory_space<vmem>>, vector<1x32xf32>
    %157 = vector.broadcast %156 : vector<1x32xf32> to vector<64x32xf32>
    %158 = arith.addf %155, %157 : vector<64x32xf32>
    %cst_119 = arith.constant 0.000000e+00 : f32
    %159 = vector.broadcast %cst_119 : f32 to vector<64x32xf32>
    %160 = arith.maximumf %158, %159 : vector<64x32xf32>
    %161 = vector.extract_strided_slice %160 {offsets = [0, 0], sizes = [1, 32], strides = [1, 1]} : vector<64x32xf32> to vector<1x32xf32>
    %c0_120 = arith.constant 0 : index
    %c0_121 = arith.constant 0 : index
    %162 = vector.load %arg11[%c0_120, %c0_121] : memref<32x32xf32, #tpu.memory_space<vmem>>, vector<32x32xf32>
    %cst_122 = arith.constant dense<0.000000e+00> : vector<1x32xf32>
    %163 = tpu.matmul %161, %162, %cst_122 {dimension_numbers = #tpu.dot_dimension_numbers<[1], [0], [0], [1], [0, 0, 1, 1], [], []>} : vector<1x32xf32>, vector<32x32xf32>, vector<1x32xf32> -> vector<1x32xf32>
    %c0_123 = arith.constant 0 : index
    %c0_124 = arith.constant 0 : index
    %164 = vector.load %arg12[%c0_123, %c0_124] : memref<1x32xf32, #tpu.memory_space<vmem>>, vector<1x32xf32>
    %165 = arith.addf %163, %164 : vector<1x32xf32>
    %cst_125 = arith.constant dense<0.000000e+00> : vector<1xf32>
    %166 = vector.multi_reduction <add>, %165, %cst_125 [1] : vector<1x32xf32> to vector<1xf32>
    %167 = vector.shape_cast %166 : vector<1xf32> to vector<1x1xf32>
    %cst_126 = arith.constant 3.200000e+01 : f32
    %168 = vector.broadcast %cst_126 : f32 to vector<1x1xf32>
    %169 = arith.divf %167, %168 : vector<1x1xf32>
    %170 = vector.broadcast %169 : vector<1x1xf32> to vector<1x32xf32>
    %171 = arith.subf %165, %170 : vector<1x32xf32>
    %172 = arith.mulf %171, %171 : vector<1x32xf32>
    %cst_127 = arith.constant dense<0.000000e+00> : vector<1xf32>
    %173 = vector.multi_reduction <add>, %172, %cst_127 [1] : vector<1x32xf32> to vector<1xf32>
    %174 = vector.shape_cast %173 : vector<1xf32> to vector<1x1xf32>
    %cst_128 = arith.constant 3.200000e+01 : f32
    %175 = vector.broadcast %cst_128 : f32 to vector<1x1xf32>
    %176 = arith.divf %174, %175 : vector<1x1xf32>
    %177 = vector.broadcast %169 : vector<1x1xf32> to vector<1x32xf32>
    %178 = arith.subf %165, %177 : vector<1x32xf32>
    %cst_129 = arith.constant 9.99999974E-6 : f32
    %179 = vector.broadcast %cst_129 : f32 to vector<1x1xf32>
    %180 = arith.addf %176, %179 : vector<1x1xf32>
    %181 = math.rsqrt %180 : vector<1x1xf32>
    %182 = vector.broadcast %181 : vector<1x1xf32> to vector<1x32xf32>
    %183 = arith.mulf %178, %182 : vector<1x32xf32>
    %c0_130 = arith.constant 0 : index
    %c0_131 = arith.constant 0 : index
    %184 = vector.load %arg13[%c0_130, %c0_131] : memref<1x32xf32, #tpu.memory_space<vmem>>, vector<1x32xf32>
    %185 = arith.mulf %183, %184 : vector<1x32xf32>
    %c0_132 = arith.constant 0 : index
    %c0_133 = arith.constant 0 : index
    %186 = vector.load %arg14[%c0_132, %c0_133] : memref<1x32xf32, #tpu.memory_space<vmem>>, vector<1x32xf32>
    %187 = arith.addf %185, %186 : vector<1x32xf32>
    %188 = math.tanh %187 : vector<1x32xf32>
    %c0_134 = arith.constant 0 : index
    %c0_135 = arith.constant 0 : index
    %c0_136 = arith.constant 0 : index
    %189 = vector.load %arg2[%c0_134, %c0_135, %c0_136] : memref<1x1x4xf32, #tpu.memory_space<vmem>>, vector<1x1x4xf32>
    %190 = vector.shape_cast %189 : vector<1x1x4xf32> to vector<1x4xf32>
    %c0_137 = arith.constant 0 : index
    %c0_138 = arith.constant 0 : index
    %191 = vector.load %arg15[%c0_137, %c0_138] : memref<32x64xf32, #tpu.memory_space<vmem>>, vector<32x64xf32>
    %cst_139 = arith.constant dense<0.000000e+00> : vector<1x64xf32>
    %192 = tpu.matmul %188, %191, %cst_139 {dimension_numbers = #tpu.dot_dimension_numbers<[1], [0], [0], [1], [0, 0, 1, 1], [], []>} : vector<1x32xf32>, vector<32x64xf32>, vector<1x64xf32> -> vector<1x64xf32>
    %c0_140 = arith.constant 0 : index
    %c0_141 = arith.constant 0 : index
    %193 = vector.load %arg16[%c0_140, %c0_141] : memref<4x64xf32, #tpu.memory_space<vmem>>, vector<4x64xf32>
    %cst_142 = arith.constant dense<0.000000e+00> : vector<1x64xf32>
    %194 = tpu.matmul %190, %193, %cst_142 {dimension_numbers = #tpu.dot_dimension_numbers<[1], [0], [0], [1], [0, 0, 1, 1], [], []>} : vector<1x4xf32>, vector<4x64xf32>, vector<1x64xf32> -> vector<1x64xf32>
    %195 = arith.addf %192, %194 : vector<1x64xf32>
    %c0_143 = arith.constant 0 : index
    %c0_144 = arith.constant 0 : index
    %196 = vector.load %arg17[%c0_143, %c0_144] : memref<1x64xf32, #tpu.memory_space<vmem>>, vector<1x64xf32>
    %197 = arith.addf %195, %196 : vector<1x64xf32>
    %cst_145 = arith.constant 0.000000e+00 : f32
    %198 = vector.broadcast %cst_145 : f32 to vector<1x64xf32>
    %199 = arith.maximumf %197, %198 : vector<1x64xf32>
    %c0_146 = arith.constant 0 : index
    %c0_147 = arith.constant 0 : index
    %200 = vector.load %arg18[%c0_146, %c0_147] : memref<64x64xf32, #tpu.memory_space<vmem>>, vector<64x64xf32>
    %cst_148 = arith.constant dense<0.000000e+00> : vector<1x64xf32>
    %201 = tpu.matmul %199, %200, %cst_148 {dimension_numbers = #tpu.dot_dimension_numbers<[1], [0], [0], [1], [0, 0, 1, 1], [], []>} : vector<1x64xf32>, vector<64x64xf32>, vector<1x64xf32> -> vector<1x64xf32>
    %c0_149 = arith.constant 0 : index
    %c0_150 = arith.constant 0 : index
    %202 = vector.load %arg19[%c0_149, %c0_150] : memref<1x64xf32, #tpu.memory_space<vmem>>, vector<1x64xf32>
    %203 = arith.addf %201, %202 : vector<1x64xf32>
    %cst_151 = arith.constant 0.000000e+00 : f32
    %204 = vector.broadcast %cst_151 : f32 to vector<1x64xf32>
    %205 = arith.maximumf %203, %204 : vector<1x64xf32>
    %c0_152 = arith.constant 0 : index
    %c0_153 = arith.constant 0 : index
    %206 = vector.load %arg20[%c0_152, %c0_153] : memref<64x2xf32, #tpu.memory_space<vmem>>, vector<64x2xf32>
    %cst_154 = arith.constant dense<0.000000e+00> : vector<1x2xf32>
    %207 = tpu.matmul %205, %206, %cst_154 {dimension_numbers = #tpu.dot_dimension_numbers<[1], [0], [0], [1], [0, 0, 1, 1], [], []>} : vector<1x64xf32>, vector<64x2xf32>, vector<1x2xf32> -> vector<1x2xf32>
    %c0_155 = arith.constant 0 : index
    %c0_156 = arith.constant 0 : index
    %208 = vector.load %arg21[%c0_155, %c0_156] : memref<1x2xf32, #tpu.memory_space<vmem>>, vector<1x2xf32>
    %209 = arith.addf %207, %208 : vector<1x2xf32>
    %c0_157 = arith.constant 0 : index
    %c0_158 = arith.constant 0 : index
    %c0_159 = arith.constant 0 : index
    %210 = vector.load %arg22[%c0_157, %c0_158, %c0_159] : memref<1x1x2xf32, #tpu.memory_space<vmem>>, vector<1x1x2xf32>
    %211 = vector.shape_cast %210 : vector<1x1x2xf32> to vector<1x2xf32>
    %212 = vector.shape_cast %209 : vector<1x2xf32> to vector<1x1x2xf32>
    tpu.vector_store %arg22[%c0_157, %c0_158, %c0_159], %212 {strides = array<i32>} : memref<1x1x2xf32, #tpu.memory_space<vmem>>, vector<1x1x2xf32>,
    return
  }
  func.func @transform_0(%arg0: i32) -> (i32, i32, i32) {
    %c0_i32 = arith.constant 0 : i32
    %c0_i32_0 = arith.constant 0 : i32
    %c0_i32_1 = arith.constant 0 : i32
    return %arg0, %c0_i32, %c0_i32_0 : i32, i32, i32
  }
  func.func @transform_1(%arg0: i32) -> (i32, i32, i32) {
    %c0_i32 = arith.constant 0 : i32
    %c0_i32_0 = arith.constant 0 : i32
    %c0_i32_1 = arith.constant 0 : i32
    return %arg0, %c0_i32, %c0_i32_0 : i32, i32, i32
  }
  func.func @transform_2(%arg0: i32) -> (i32, i32) {
    %c0_i32 = arith.constant 0 : i32
    %c0_i32_0 = arith.constant 0 : i32
    %c0_i32_1 = arith.constant 0 : i32
    return %c0_i32, %c0_i32_0 : i32, i32
  }
  func.func @transform_3(%arg0: i32) -> (i32, i32) {
    %c0_i32 = arith.constant 0 : i32
    %c0_i32_0 = arith.constant 0 : i32
    %c0_i32_1 = arith.constant 0 : i32
    return %c0_i32, %c0_i32_0 : i32, i32
  }
  func.func @transform_4(%arg0: i32) -> (i32, i32, i32) {
    %c0_i32 = arith.constant 0 : i32
    %c0_i32_0 = arith.constant 0 : i32
    %c0_i32_1 = arith.constant 0 : i32
    %c0_i32_2 = arith.constant 0 : i32
    return %c0_i32, %c0_i32_0, %c0_i32_1 : i32, i32, i32
  }
  func.func @transform_5(%arg0: i32) -> (i32, i32) {
    %c0_i32 = arith.constant 0 : i32
    %c0_i32_0 = arith.constant 0 : i32
    %c0_i32_1 = arith.constant 0 : i32
    return %c0_i32, %c0_i32_0 : i32, i32
  }
  func.func @transform_6(%arg0: i32) -> (i32, i32, i32) {
    %c0_i32 = arith.constant 0 : i32
    %c0_i32_0 = arith.constant 0 : i32
    %c0_i32_1 = arith.constant 0 : i32
    %c0_i32_2 = arith.constant 0 : i32
    return %c0_i32, %c0_i32_0, %c0_i32_1 : i32, i32, i32
  }
  func.func @transform_7(%arg0: i32) -> (i32, i32) {
    %c0_i32 = arith.constant 0 : i32
    %c0_i32_0 = arith.constant 0 : i32
    %c0_i32_1 = arith.constant 0 : i32
    return %c0_i32, %c0_i32_0 : i32, i32
  }
  func.func @transform_8(%arg0: i32) -> (i32, i32, i32) {
    %c0_i32 = arith.constant 0 : i32
    %c0_i32_0 = arith.constant 0 : i32
    %c0_i32_1 = arith.constant 0 : i32
    %c0_i32_2 = arith.constant 0 : i32
    return %c0_i32, %c0_i32_0, %c0_i32_1 : i32, i32, i32
  }
  func.func @transform_9(%arg0: i32) -> (i32, i32) {
    %c0_i32 = arith.constant 0 : i32
    %c0_i32_0 = arith.constant 0 : i32
    %c0_i32_1 = arith.constant 0 : i32
    return %c0_i32, %c0_i32_0 : i32, i32
  }
  func.func @transform_10(%arg0: i32) -> (i32, i32) {
    %c0_i32 = arith.constant 0 : i32
    %c0_i32_0 = arith.constant 0 : i32
    %c0_i32_1 = arith.constant 0 : i32
    return %c0_i32, %c0_i32_0 : i32, i32
  }
  func.func @transform_11(%arg0: i32) -> (i32, i32) {
    %c0_i32 = arith.constant 0 : i32
    %c0_i32_0 = arith.constant 0 : i32
    %c0_i32_1 = arith.constant 0 : i32
    return %c0_i32, %c0_i32_0 : i32, i32
  }
  func.func @transform_12(%arg0: i32) -> (i32, i32) {
    %c0_i32 = arith.constant 0 : i32
    %c0_i32_0 = arith.constant 0 : i32
    %c0_i32_1 = arith.constant 0 : i32
    return %c0_i32, %c0_i32_0 : i32, i32
  }
  func.func @transform_13(%arg0: i32) -> (i32, i32) {
    %c0_i32 = arith.constant 0 : i32
    %c0_i32_0 = arith.constant 0 : i32
    %c0_i32_1 = arith.constant 0 : i32
    return %c0_i32, %c0_i32_0 : i32, i32
  }
  func.func @transform_14(%arg0: i32) -> (i32, i32) {
    %c0_i32 = arith.constant 0 : i32
    %c0_i32_0 = arith.constant 0 : i32
    %c0_i32_1 = arith.constant 0 : i32
    return %c0_i32, %c0_i32_0 : i32, i32
  }
  func.func @transform_15(%arg0: i32) -> (i32, i32) {
    %c0_i32 = arith.constant 0 : i32
    %c0_i32_0 = arith.constant 0 : i32
    %c0_i32_1 = arith.constant 0 : i32
    return %c0_i32, %c0_i32_0 : i32, i32
  }
  func.func @transform_16(%arg0: i32) -> (i32, i32) {
    %c0_i32 = arith.constant 0 : i32
    %c0_i32_0 = arith.constant 0 : i32
    %c0_i32_1 = arith.constant 0 : i32
    return %c0_i32, %c0_i32_0 : i32, i32
  }
  func.func @transform_17(%arg0: i32) -> (i32, i32) {
    %c0_i32 = arith.constant 0 : i32
    %c0_i32_0 = arith.constant 0 : i32
    %c0_i32_1 = arith.constant 0 : i32
    return %c0_i32, %c0_i32_0 : i32, i32
  }
  func.func @transform_18(%arg0: i32) -> (i32, i32) {
    %c0_i32 = arith.constant 0 : i32
    %c0_i32_0 = arith.constant 0 : i32
    %c0_i32_1 = arith.constant 0 : i32
    return %c0_i32, %c0_i32_0 : i32, i32
  }
  func.func @transform_19(%arg0: i32) -> (i32, i32) {
    %c0_i32 = arith.constant 0 : i32
    %c0_i32_0 = arith.constant 0 : i32
    %c0_i32_1 = arith.constant 0 : i32
    return %c0_i32, %c0_i32_0 : i32, i32
  }
  func.func @transform_20(%arg0: i32) -> (i32, i32) {
    %c0_i32 = arith.constant 0 : i32
    %c0_i32_0 = arith.constant 0 : i32
    %c0_i32_1 = arith.constant 0 : i32
    return %c0_i32, %c0_i32_0 : i32, i32
  }
  func.func @transform_21(%arg0: i32) -> (i32, i32, i32) {
    %c0_i32 = arith.constant 0 : i32
    %c0_i32_0 = arith.constant 0 : i32
    %c0_i32_1 = arith.constant 0 : i32
    return %arg0, %c0_i32, %c0_i32_0 : i32, i32, i32
  }
}

</mosaic_0001>

<bundles_post_ra>
// kernel: critic_forward.1
= control target key start
LH: loop header
LB: loop body
LE: loop exit
PB: predicated region body
PF: predicated region fallthrough
CT: control target
= control target key end

     0   :  { %s7695_s0 = inlined_call_operand.vmem [shape: f32[2,64,36], index: 0, kind: input, shape index: {}]   ;;  %s7696_s1 = inlined_call_operand.vmem [shape: f32[2,1,4], index: 1, kind: input, shape index: {}]   ;;  %s7697_s2 = inlined_call_operand.vmem [shape: f32[36,32], index: 2, kind: input, shape index: {}]   ;;  %s7698_s3 = inlined_call_operand.vmem [shape: f32[1,32], index: 3, kind: input, shape index: {}]   ;;  %s7699_s4 = inlined_call_operand.vmem [shape: f32[9,32,32], index: 4, kind: input, shape index: {}]   ;;  %s7700_s5 = inlined_call_operand.vmem [shape: f32[1,32], index: 5, kind: input, shape index: {}]   ;;  %s7701_s6 = inlined_call_operand.vmem [shape: f32[9,32,32], index: 6, kind: input, shape index: {}]   ;;  %s7702_s7 = inlined_call_operand.vmem [shape: f32[1,32], index: 7, kind: input, shape index: {}]   ;;  %s7703_s8 = inlined_call_operand.vmem [shape: f32[9,32,32], index: 8, kind: input, shape index: {}]   ;;  %s7704_s9 = inlined_call_operand.vmem [shape: f32[1,32], index: 9, kind: input, shape index: {}]   ;;  %s7705_s10 = inlined_call_operand.vmem [shape: f32[32,32], index: 10, kind: input, shape index: {}]   ;;  %s7706_s11 = inlined_call_operand.vmem [shape: f32[1,32], index: 11, kind: input, shape index: {}]   ;;  %s7707_s12 = inlined_call_operand.vmem [shape: f32[1,32], index: 12, kind: input, shape index: {}]   ;;  %s7708_s13 = inlined_call_operand.vmem [shape: f32[1,32], index: 13, kind: input, shape index: {}]   ;;  %s7709_s14 = inlined_call_operand.vmem [shape: f32[32,64], index: 14, kind: input, shape index: {}]   ;;  %s7710_s15 = inlined_call_operand.vmem [shape: f32[4,64], index: 15, kind: input, shape index: {}]   ;;  %s7711_s16 = inlined_call_operand.vmem [shape: f32[1,64], index: 16, kind: input, shape index: {}]   ;;  %s7712_s17 = inlined_call_operand.vmem [shape: f32[64,64], index: 17, kind: input, shape index: {}]   ;;  %s7713_s18 = inlined_call_operand.vmem [shape: f32[1,64], index: 18, kind: input, shape index: {}]   ;;  %s7714_s19 = inlined_call_operand.vmem [shape: f32[64,2], index: 19, kind: input, shape index: {}]   ;;  %s7715_s20 = inlined_call_operand.vmem [shape: f32[1,2], index: 20, kind: input, shape index: {}]   ;;  %s7716_s21 = inlined_call_operand.vmem [shape: f32[2,1,2], index: 21, kind: output, shape index: {}]  }
   0x1   :  { %7720 = sst [smem:[#allocation2_spill]] %s7695_s0 }
   0x2   :  { %7721 = sst [smem:[#allocation3_spill]] %s7696_s1 }
   0x3   :  { %7722 = sst [smem:[#allocation4_spill]] %s7697_s2  ;;  %s6524_s2 = smov 0  }
   0x4   :  { %7723 = sst [smem:[#allocation5_spill]] %s7698_s3 }
   0x5   :  { %7724 = sst [smem:[#allocation6_spill]] %s7699_s4 }
   0x6   :  { %7725 = sst [smem:[#allocation7_spill]] %s7700_s5 }
   0x7 LB: > { %s4674_s25 = sadd.s32 4294967295, %s6409_s2   ;;  %p4678_p0 = scmp.ge.s32.totalorder %s6409_s2, 1  ;;  %s6409_s2 = sphi %s6524_s2, %s31_s2  }
   0x8   : > { %p595_p1 = scmp.lt.s32.totalorder %s6409_s2, 3 }
   0xa   : > { %p596_p2 = pnand %p4678_p0, %p595_p1 }
   0xb   : > { %s7726_s3 = sld [smem:[#allocation4_spill]] (!%p596_p2)  ;;  %p656_p3 = scmp.lt.s32.totalorder (!%p596_p2), %s4674_s25, 1  ;;  %vm720_vm0 = vcmask (!%p596_p2), 1043456   ;;  %vm695_vm1 = vcmask (!%p596_p2), 293888   ;;  %vm855_vm2 = vcmask (!%p596_p2), 1046528   ;;  %vm1121_vm3 = vcmask (!%p596_p2), 1045504  }
   0xc   : > { %599 = sbr.rel (%p596_p2) target bundleno = 2430 (0x97e), region = 104  ;;  %s7727_s24 = sld [smem:[#allocation2_spill]] (!%p596_p2)  ;;  %vm873_vm4 = vcmask (!%p596_p2), 261120   ;;  %vm6413_vm5 = vmmov (!%p596_p2), 0   ;;  %vm4271_vm6 = vcmask (!%p596_p2), 253952   ;;  %vm4297_vm7 = vcmask (!%p596_p2), 31744  }
   0xd   : > { %s7728_s4 = sld [smem:[#allocation6_spill]] (!%p596_p2)  ;;  %s7729_s5 = sld [smem:[#allocation5_spill]] (!%p596_p2)  ;;  %vm4459_vm8 = vcmask (!%p596_p2), 523264   ;;  %vm4616_vm9 = vcmask (!%p596_p2), 8192  }
   0xe   : > { %s7730_s0 = sld [smem:[#allocation7_spill]] (!%p596_p2)  ;;  %s7731_s30 = sld [smem:[#allocation3_spill]] (!%p596_p2) }
  0x11   : > { %v683_v0 = vld [vmem:[%s7726_s3] sm:$0xff] (!%p596_p2)  ;;  %v684_v1 = vld [vmem:[%s7726_s3 + $0x8] sm:$0xff] (!%p596_p2)  ;;  %v685_v2 = vld [vmem:[%s7726_s3 + $0x10] sm:$0xff] (!%p596_p2) }
  0x12   : > { %v6000_v3 = vpack.c.bf16 (!%p596_p2), %v684_v1, %v683_v0  ;;  %v686_v4 = vld [vmem:[%s7726_s3 + $0x18] sm:$0xff] (!%p596_p2)  ;;  %v687_v6 = vld [vmem:[%s7726_s3 + $0x20] sm:$0xf] (!%p596_p2) }
  0x13   : > { %v6004_v5 = vpack.c.bf16 %v686_v4, %v685_v2  ;;  %s7733_s25 = smov (!%p656_p3, %s4674_s25), 1  ;;  %v4691_v23 = vld [vmem:[%s7728_s4 + $0x20] sm:$0xff]  ;;  %v4692_v24 = vld [vmem:[%s7728_s4 + $0x28] sm:$0xff]  ;;  %v4693_v26 = vld [vmem:[%s7728_s4 + $0x30] sm:$0xff] }
  0x14   : > { %6001 = vmatprep.subr.bf16.mxu0 %v6000_v3  ;;  %s5005_s22 = sshll.u32 %s7733_s25, 6  ;;  %v6008_v25 = vpack.c.bf16 %v4692_v24, %v4691_v23  ;;  %v4694_v27 = vld [vmem:[%s7728_s4 + $0x38] sm:$0xff]  ;;  %v837_v29 = vld [vmem:[%s7728_s4] sm:$0xff]  ;;  %v838_v30 = vld [vmem:[%s7728_s4 + $0x8] sm:$0xff] }
  0x15   : > { %6003 = vmatpush3.bf16.msra.mxu0 %v6000_v3  ;;  %s660_s26 = scalar_lea.vmem %s7727_s24, %s5005_s22  ;;  %v6012_v28 = vpack.c.bf16 %v4694_v27, %v4693_v26  ;;  %v6016_v31 = vpack.c.bf16 %v838_v30, %v837_v29  ;;  %v4681_v32 = vld [vmem:[%s7729_s5] ss:$0 sm:$0xff]  ;;  %v839_v51 = vld [vmem:[%s7728_s4 + $0x10] sm:$0xff]  ;;  %v840_v52 = vld [vmem:[%s7728_s4 + $0x18] sm:$0xff]  ;;  %s663_s5 = scalar_lea.vmem %s7731_s30, %s7733_s25 }
  0x16   : > { %6005 = vmatprep.subr.bf16.mxu0 %v6004_v5  ;;  %v667_v7 = vld [vmem:[%s660_s26] sm:$0xff]  ;;  %v668_v8 = vld [vmem:[%s660_s26 + $0x8] sm:$0xff]  ;;  %v669_v10 = vld [vmem:[%s660_s26 + $0x10] sm:$0xff]  ;;  %6009 = vmatprep.subr.bf16.mxu1 %v6008_v25  ;;  %v6020_v60 = vpack.c.bf16 %v840_v52, %v839_v51 }
  0x17   : > { %v675_v9 = vmul.f32 0.003921569, %v667_v7  ;;  %v676_v11 = vmul.f32 0.003921569, %v668_v8  ;;  %v677_v12 = vmul.f32 0.003921569, %v669_v10  ;;  %6011 = vmatpush3.bf16.msra.mxu1 %v6008_v25 }
  0x18   : > { %v670_v13 = vld [vmem:[%s660_s26 + $0x18] sm:$0xff]  ;;  %v671_v14 = vld [vmem:[%s660_s26 + $0x20] sm:$0xff]  ;;  %v672_v17 = vld [vmem:[%s660_s26 + $0x28] sm:$0xff]  ;;  %6013 = vmatprep.subr.bf16.mxu1 %v6012_v28 }
  0x19   : > { %6007 = vmatpush3.bf16.msra.mxu0 %v6004_v5  ;;  %5383 = vmatprep.mubr.msk.f32.mxu0 %vm695_vm1, %v675_v9  ;;  %v678_v15 = vmul.f32 0.003921569, %v670_v13  ;;  %v679_v16 = vmul.f32 0.003921569, %v671_v14  ;;  %v673_v18 = vld [vmem:[%s660_s26 + $0x30] sm:$0xff]  ;;  %v674_v21 = vld [vmem:[%s660_s26 + $0x38] sm:$0xff] }
  0x1a   : > { %5381 = vmatprep.subr.msk.mxu0 %vm720_vm0, %v687_v6  ;;  %v680_v19 = vmul.f32 0.003921569, %v672_v17  ;;  %v681_v20 = vmul.f32 0.003921569, %v673_v18  ;;  %v682_v22 = vmul.f32 0.003921569, %v674_v21 }
  0x1b   : > { %6015 = vmatpush3.bf16.msra.mxu1 %v6012_v28  ;;  %v4711_v1 = vld [vmem:[%s7728_s4 + $0x40] sm:$0xff]  ;;  %v4712_v2 = vld [vmem:[%s7728_s4 + $0x48] sm:$0xff]  ;;  %v6411_v17 = vmov 0.0   ;;  %v4714_v21 = vld [vmem:[%s7728_s4 + $0x58] sm:$0xff] }
  0x1c   : > { %6017 = vmatprep.subr.bf16.mxu1 %v6016_v31  ;;  %v6024_v9 = vpack.c.bf16 %v4712_v2, %v4711_v1  ;;  %v6656_v18 = vrot.slane %v6411_v17, 1  ;;  %v4794_v23 = vld [vmem:[%s7701_s6 + $0x28] sm:$0xff]  ;;  %v4723_v26 = vld [vmem:[%s7728_s4 + $0x60] sm:$0xff]  ;;  %v4725_v30 = vld [vmem:[%s7728_s4 + $0x70] sm:$0xff] }
  0x1d   : > { %5382 = vmatpush3.msk.msra.mxu0 %vm720_vm0, %v687_v6  ;;  %v4724_v27 = vld [vmem:[%s7728_s4 + $0x68] sm:$0xff]  ;;  %v4736_v52 = vld [vmem:[%s7728_s4 + $0x90] sm:$0xff] }
  0x1e   : > { %5384 = vmatmul.mubr.msk.f32.vlgmr.msra.gmra.mrb[0].mxu0 %vm695_vm1, %v676_v11  ;;  %v6032_v28 = vpack.c.bf16 %v4724_v27, %v4723_v26  ;;  %v4759_v1 = vld [vmem:[%s7728_s4 + $0xc8] sm:$0xff] }
  0x1f   : > { %5386 = vmatprep.mubr.msk.f32.mxu0 %vm695_vm1, %v677_v12 }
  0x22   : > { %5387 = vmatmul.mubr.msk.f32.gmra.mrb[2].mxu0 %vm695_vm1, %v678_v15 }
  0x23   : > { %5389 = vmatprep.mubr.msk.f32.mxu0 %vm695_vm1, %v679_v16 }
  0x26   : > { %5390 = vmatmul.mubr.msk.f32.gmra.mrb[4].mxu0 %vm695_vm1, %v680_v19 }
  0x27   : > { %5392 = vmatprep.mubr.msk.f32.mxu0 %vm695_vm1, %v681_v20  ;;  %v4713_v20 = vld [vmem:[%s7728_s4 + $0x50] sm:$0xff] }
  0x28   : > { %v6028_v25 = vpack.c.bf16 %v4714_v21, %v4713_v20  ;;  %v4780_v20 = vld [vmem:[%s7728_s4 + $0x100] sm:$0xff]  ;;  %v4781_v21 = vld [vmem:[%s7728_s4 + $0x108] sm:$0xff] }
  0x2a   : > { %5393 = vmatmul.mubr.msk.f32.gmra.mrb[6].mxu0 %vm695_vm1, %v682_v22  ;;  %v4793_v22 = vld [vmem:[%s7701_s6 + $0x20] sm:$0xff] }
  0x2b   : > { %v6080_v24 = vpack.c.bf16 %v4794_v23, %v4793_v22  ;;  %v6072_v22 = vpack.c.bf16 %v4781_v21, %v4780_v20  ;;  %v4815_v21 = vld [vmem:[%s7701_s6 + $0x50] sm:$0xff] }
  0x2d   : > { %6081 = vmatprep.subr.bf16.mxu0 %v6080_v24 }
  0x2e   : > { %6083 = vmatpush3.bf16.msra.mxu0 %v6080_v24 }
  0xf1   : > { %v5385_v33 = vpop.f32.mrb[0].mxu0 }
  0xf2   : > { %v796_v34 = vadd.f32 %v5385_v33, %v4681_v32  ;;  %v790_v35 = vpop.f32.mrb[1].mxu0 }
  0xf3   : > { %v791_v36 = vadd.f32 %v4681_v32, %v790_v35 }
  0xf4   : > { %v6584_v37 = vmax.f32 %v796_v34, 0.0 }
  0xf5   : > { %v6586_v38 = vmax.f32 %v791_v36, 0.0  ;;  %v5388_v39 = vpop.f32.mrb[2].mxu0  ;;  %v4734_v36 = vld [vmem:[%s7728_s4 + $0x80] sm:$0xff] }
  0xf6   : > { %v806_v40 = vadd.f32 %v5388_v39, %v4681_v32  ;;  %v800_v41 = vpop.f32.mrb[3].mxu0  ;;  %v857_v42 = vrot.slane %v6584_v37, 1  ;;  %v1123_v43 = vrot.slane %v6584_v37, 2 }
  0xf7   : > { %v1122_v44 = vrot.slane %v6586_v38, 2  ;;  %v801_v45 = vadd.f32 %v4681_v32, %v800_v41  ;;  %v856_v46 = vrot.slane %v6586_v38, 1 }
  0xf8   : > { %v6592_v47 = vmax.f32 %v806_v40, 0.0 }
  0xf9   : > { %v6594_v48 = vmax.f32 %v801_v45, 0.0  ;;  %v5391_v49 = vpop.f32.mrb[4].mxu0  ;;  %v858_v50 = vsel %vm855_vm2, %v856_v46, %v857_v42  ;;  %v6606_v53 = vsel %vm1121_vm3, %v1122_v44, %v1123_v43 }
  0xfa   : > { %v816_v54 = vadd.f32 %v5391_v49, %v4681_v32  ;;  %v810_v55 = vpop.f32.mrb[5].mxu0  ;;  %5403 = vmatprep.mubr.msk.f32.mxu1 %vm873_vm4, %v858_v50  ;;  %v861_v56 = vrot.slane %v6592_v47, 1  ;;  %v6748_v49 = vrot.slane %v6411_v17, 2 }
  0xfb   : > { %v811_v57 = vadd.f32 %v4681_v32, %v810_v55  ;;  %v859_v58 = vrot.slane %v6594_v48, 1  ;;  %v1125_v29 = vrot.slane %v6594_v48, 2  ;;  %v4746_v55 = vld [vmem:[%s7728_s4 + $0xa0] sm:$0xff] }
  0xfc   : > { %v6611_v59 = vmax.f32 %v816_v54, 0.0 }
  0xfd   : > { %v6613_v61 = vmax.f32 %v811_v57, 0.0  ;;  %v5394_v62 = vpop.f32.mrb[6].mxu0  ;;  %v6616_v63 = vsel %vm855_vm2, %v857_v42, %v859_v58  ;;  %v6619_v0 = vsel %vm855_vm2, %v859_v58, %v861_v56  ;;  %v6715_v34 = vsel %vm1121_vm3, %v1123_v43, %v1125_v29  ;;  %v4749_v58 = vld [vmem:[%s7728_s4 + $0xb8] sm:$0xff] }
  0xfe   : > { %v826_v3 = vadd.f32 %v5394_v62, %v4681_v32  ;;  %v820_v4 = vpop.f32.mrb[7].mxu0  ;;  %5404 = vmatmul.mubr.msk.f32.vlgmr.msra.gmra.mrb[0].mxu1 %vm873_vm4, %v6616_v63  ;;  %v865_v5 = vrot.slane %v6611_v59, 1  ;;  %v1131_v40 = vrot.slane %v6611_v59, 2  ;;  %v4758_v62 = vld [vmem:[%s7728_s4 + $0xc0] sm:$0xff] }
  0xff   : > { %v821_v6 = vadd.f32 %v4681_v32, %v820_v4  ;;  %6019 = vmatpush3.bf16.msra.mxu1 %v6016_v31  ;;  %5406 = vmatprep.mubr.msk.f32.mxu1 %vm873_vm4, %v6619_v0  ;;  %v863_v7 = vrot.slane %v6613_v61, 1  ;;  %v4726_v31 = vld [vmem:[%s7728_s4 + $0x78] sm:$0xff]  ;;  %v1127_v32 = vrot.slane %v6592_v47, 2  ;;  %v1129_v35 = vrot.slane %v6613_v61, 2 }
 0x100   : > { %v6633_v8 = vmax.f32 %v826_v3, 0.0  ;;  %6021 = vmatprep.subr.bf16.mxu1 %v6020_v60  ;;  %v6036_v33 = vpack.c.bf16 %v4726_v31, %v4725_v30  ;;  %v6056_v2 = vpack.c.bf16 %v4759_v1, %v4758_v62  ;;  %v4761_v3 = vld [vmem:[%s7728_s4 + $0xd8] sm:$0xff] }
 0x101   : > { %v6635_v10 = vmax.f32 %v821_v6, 0.0  ;;  %v6638_v11 = vsel %vm855_vm2, %v861_v56, %v863_v7  ;;  %v6641_v12 = vsel %vm855_vm2, %v863_v7, %v865_v5  ;;  %v6727_v39 = vsel %vm1121_vm3, %v1125_v29, %v1127_v32  ;;  %v4747_v56 = vld [vmem:[%s7728_s4 + $0xa8] sm:$0xff] }
 0x102   : > { %5407 = vmatmul.mubr.msk.f32.gmra.mrb[2].mxu1 %vm873_vm4, %v6638_v11  ;;  %v869_v13 = vrot.slane %v6633_v8, 1  ;;  %v6733_v42 = vsel %vm1121_vm3, %v1127_v32, %v1129_v35  ;;  %v6739_v44 = vsel %vm1121_vm3, %v1129_v35, %v1131_v40  ;;  %v1135_v45 = vrot.slane %v6633_v8, 2  ;;  %v4769_v6 = vld [vmem:[%s7728_s4 + $0xe8] sm:$0xff] }
 0x103   : > { %5409 = vmatprep.mubr.msk.f32.mxu1 %vm873_vm4, %v6641_v12  ;;  %v867_v14 = vrot.slane %v6635_v10, 1  ;;  %6023 = vmatpush3.bf16.msra.mxu1 %v6020_v60  ;;  %v1133_v43 = vrot.slane %v6635_v10, 2  ;;  %v6048_v57 = vpack.c.bf16 %v4747_v56, %v4746_v55 }
 0x104   : > { %6025 = vmatprep.subr.bf16.mxu1 %v6024_v9  ;;  %v6664_v19 = vsel %vm855_vm2, %v869_v13, %v6656_v18  ;;  %v6759_v51 = vsel %vm1121_vm3, %v1135_v45, %v6748_v49 }
 0x105   : > { %v6650_v15 = vsel %vm855_vm2, %v865_v5, %v867_v14  ;;  %v6653_v16 = vsel %vm855_vm2, %v867_v14, %v869_v13  ;;  %v6745_v46 = vsel %vm1121_vm3, %v1131_v40, %v1133_v43  ;;  %v6753_v50 = vsel %vm1121_vm3, %v1133_v43, %v1135_v45  ;;  %v4768_v5 = vld [vmem:[%s7728_s4 + $0xe0] sm:$0xff]  ;;  %v4771_v13 = vld [vmem:[%s7728_s4 + $0xf8] sm:$0xff]  ;;  %v2009_v40 = vld [vmem:[%s7701_s6 + $0x10] sm:$0xff] }
 0x106   : > { %5410 = vmatmul.mubr.msk.f32.gmra.mrb[4].mxu1 %vm873_vm4, %v6650_v15  ;;  %v6064_v7 = vpack.c.bf16 %v4769_v6, %v4768_v5 }
 0x107   : > { %5412 = vmatprep.mubr.msk.f32.mxu1 %vm873_vm4, %v6653_v16 }
 0x10a   : > { %5413 = vmatmul.mubr.msk.f32.gmra.mrb[6].mxu1 %vm873_vm4, %v6664_v19 }
 0x10b   : > { %5423 = vmatprep.mubr.msk.f32.mxu1 %vm873_vm4, %v6586_v38  ;;  %v4735_v38 = vld [vmem:[%s7728_s4 + $0x88] sm:$0xff] }
 0x10c   : > { %v6040_v41 = vpack.c.bf16 %v4735_v38, %v4734_v36 }
 0x10e   : > { %5424 = vmatmul.mubr.msk.f32.vlgmr.msra.gmra.mrb[0].mxu1 %vm873_vm4, %v6584_v37 }
 0x10f   : > { %6027 = vmatpush3.bf16.msra.mxu1 %v6024_v9  ;;  %5426 = vmatprep.mubr.msk.f32.mxu1 %vm873_vm4, %v6594_v48  ;;  %v4770_v9 = vld [vmem:[%s7728_s4 + $0xf0] sm:$0xff] }
 0x110   : > { %6029 = vmatprep.subr.bf16.mxu1 %v6028_v25  ;;  %v6068_v14 = vpack.c.bf16 %v4771_v13, %v4770_v9 }
 0x112   : > { %5427 = vmatmul.mubr.msk.f32.gmra.mrb[2].mxu1 %vm873_vm4, %v6592_v47 }
 0x113   : > { %5429 = vmatprep.mubr.msk.f32.mxu1 %vm873_vm4, %v6613_v61  ;;  %6031 = vmatpush3.bf16.msra.mxu1 %v6028_v25 }
 0x114   : > { %6033 = vmatprep.subr.bf16.mxu1 %v6032_v28 }
 0x116   : > { %5430 = vmatmul.mubr.msk.f32.gmra.mrb[4].mxu1 %vm873_vm4, %v6611_v59 }
 0x117   : > { %5432 = vmatprep.mubr.msk.f32.mxu1 %vm873_vm4, %v6635_v10 }
 0x11a   : > { %5433 = vmatmul.mubr.msk.f32.gmra.mrb[6].mxu1 %vm873_vm4, %v6633_v8 }
 0x11b   : > { %5443 = vmatprep.mubr.msk.f32.mxu1 %vm873_vm4, %v6606_v53  ;;  %v4737_v53 = vld [vmem:[%s7728_s4 + $0x98] sm:$0xff] }
 0x11c   : > { %v6044_v54 = vpack.c.bf16 %v4737_v53, %v4736_v52 }
 0x11e   : > { %5444 = vmatmul.mubr.msk.f32.vlgmr.msra.gmra.mrb[0].mxu1 %vm873_vm4, %v6715_v34 }
 0x11f   : > { %6035 = vmatpush3.bf16.msra.mxu1 %v6032_v28  ;;  %5446 = vmatprep.mubr.msk.f32.mxu1 %vm873_vm4, %v6727_v39 }
 0x120   : > { %6037 = vmatprep.subr.bf16.mxu1 %v6036_v33 }
 0x122   : > { %5447 = vmatmul.mubr.msk.f32.gmra.mrb[2].mxu1 %vm873_vm4, %v6733_v42 }
 0x123   : > { %5449 = vmatprep.mubr.msk.f32.mxu1 %vm873_vm4, %v6739_v44  ;;  %6039 = vmatpush3.bf16.msra.mxu1 %v6036_v33 }
 0x124   : > { %6041 = vmatprep.subr.bf16.mxu1 %v6040_v41 }
 0x126   : > { %5450 = vmatmul.mubr.msk.f32.gmra.mrb[4].mxu1 %vm873_vm4, %v6745_v46 }
 0x127   : > { %5452 = vmatprep.mubr.msk.f32.mxu1 %vm873_vm4, %v6753_v50 }
 0x12a   : > { %5453 = vmatmul.mubr.msk.f32.gmra.mrb[6].mxu1 %vm873_vm4, %v6759_v51 }
 0x12b   : > { %5463 = vmatprep.mubr.msk.f32.mxu1 %vm873_vm4, %v6584_v37  ;;  %v4748_v37 = vld [vmem:[%s7728_s4 + $0xb0] sm:$0xff] }
 0x12c   : > { %v6052_v60 = vpack.c.bf16 %v4749_v58, %v4748_v37  ;;  %v4814_v37 = vld [vmem:[%s7701_s6 + $0x48] sm:$0xff] }
 0x12e   : > { %5464 = vmatmul.mubr.msk.f32.vlgmr.msra.gmra.mrb[0].mxu1 %vm873_vm4, %v6594_v48 }
 0x12f   : > { %6043 = vmatpush3.bf16.msra.mxu1 %v6040_v41  ;;  %5466 = vmatprep.mubr.msk.f32.mxu1 %vm873_vm4, %v6592_v47  ;;  %v2010_v41 = vld [vmem:[%s7701_s6 + $0x18] sm:$0xff] }
 0x130   : > { %6045 = vmatprep.subr.bf16.mxu1 %v6044_v54  ;;  %v6092_v52 = vpack.c.bf16 %v2010_v41, %v2009_v40  ;;  %v4838_v41 = vld [vmem:[%s7701_s6 + $0x90] sm:$0xff] }
 0x132   : > { %5467 = vmatmul.mubr.msk.f32.gmra.mrb[2].mxu1 %vm873_vm4, %v6613_v61 }
 0x133   : > { %5469 = vmatprep.mubr.msk.f32.mxu1 %vm873_vm4, %v6611_v59  ;;  %6047 = vmatpush3.bf16.msra.mxu1 %v6044_v54 }
 0x134   : > { %6049 = vmatprep.subr.bf16.mxu1 %v6048_v57 }
 0x136   : > { %5470 = vmatmul.mubr.msk.f32.gmra.mrb[4].mxu1 %vm873_vm4, %v6635_v10 }
 0x137   : > { %5472 = vmatprep.mubr.msk.f32.mxu1 %vm873_vm4, %v6633_v8 }
 0x13a   : > { %5473 = vmatmul.mubr.f32.gmra.mrb[6].mxu1 %v6411_v17 }
 0x13b   : > { %5483 = vmatprep.mubr.msk.f32.mxu1 %vm873_vm4, %v6616_v63  ;;  %v4760_v63 = vld [vmem:[%s7728_s4 + $0xd0] sm:$0xff] }
 0x13c   : > { %v6060_v4 = vpack.c.bf16 %v4761_v3, %v4760_v63 }
 0x13e   : > { %5484 = vmatmul.mubr.msk.f32.vlgmr.msra.gmra.mrb[0].mxu1 %vm873_vm4, %v6619_v0 }
 0x13f   : > { %6051 = vmatpush3.bf16.msra.mxu1 %v6048_v57  ;;  %5486 = vmatprep.mubr.msk.f32.mxu1 %vm873_vm4, %v6638_v11  ;;  %v4813_v57 = vld [vmem:[%s7701_s6 + $0x40] sm:$0xff] }
 0x140   : > { %6053 = vmatprep.subr.bf16.mxu1 %v6052_v60  ;;  %v6096_v3 = vpack.c.bf16 %v4814_v37, %v4813_v57  ;;  %v4861_v57 = vld [vmem:[%s7701_s6 + $0xc8] sm:$0xff] }
 0x142   : > { %5487 = vmatmul.mubr.msk.f32.gmra.mrb[2].mxu1 %vm873_vm4, %v6641_v12 }
 0x143   : > { %5489 = vmatprep.mubr.msk.f32.mxu1 %vm873_vm4, %v6650_v15  ;;  %6055 = vmatpush3.bf16.msra.mxu1 %v6052_v60 }
 0x144   : > { %6057 = vmatprep.subr.bf16.mxu1 %v6056_v2 }
 0x146   : > { %5490 = vmatmul.mubr.msk.f32.gmra.mrb[4].mxu1 %vm873_vm4, %v6653_v16 }
 0x147   : > { %5492 = vmatprep.mubr.msk.f32.mxu1 %vm873_vm4, %v6664_v19 }
 0x14a   : > { %5493 = vmatmul.mubr.msk.f32.gmra.mrb[6].mxu1 %vm873_vm4, %v6656_v18 }
 0x14b   : > { %5503 = vmatprep.mubr.msk.f32.mxu1 %vm873_vm4, %v6715_v34 }
 0x14e   : > { %5504 = vmatmul.mubr.msk.f32.vlgmr.msra.gmra.mrb[0].mxu1 %vm873_vm4, %v6727_v39 }
 0x14f   : > { %6059 = vmatpush3.bf16.msra.mxu1 %v6056_v2  ;;  %5506 = vmatprep.mubr.msk.f32.mxu1 %vm873_vm4, %v6733_v42 }
 0x150   : > { %6061 = vmatprep.subr.bf16.mxu1 %v6060_v4 }
 0x152   : > { %5507 = vmatmul.mubr.msk.f32.gmra.mrb[2].mxu1 %vm873_vm4, %v6739_v44 }
 0x153   : > { %5509 = vmatprep.mubr.msk.f32.mxu1 %vm873_vm4, %v6745_v46  ;;  %6063 = vmatpush3.bf16.msra.mxu1 %v6060_v4 }
 0x154   : > { %6065 = vmatprep.subr.bf16.mxu1 %v6064_v7 }
 0x156   : > { %5510 = vmatmul.mubr.msk.f32.gmra.mrb[4].mxu1 %vm873_vm4, %v6753_v50 }
 0x157   : > { %5512 = vmatprep.mubr.msk.f32.mxu1 %vm873_vm4, %v6759_v51 }
 0x15a   : > { %5513 = vmatmul.mubr.msk.f32.gmra.mrb[6].mxu1 %vm873_vm4, %v6748_v49 }
 0x15b   : > { %5523 = vmatprep.mubr.msk.f32.mxu1 %vm873_vm4, %v6594_v48  ;;  %v4783_v48 = vld [vmem:[%s7728_s4 + $0x118] sm:$0xff] }
 0x15e   : > { %5524 = vmatmul.mubr.msk.f32.vlgmr.msra.gmra.mrb[0].mxu1 %vm873_vm4, %v6592_v47  ;;  %v4782_v47 = vld [vmem:[%s7728_s4 + $0x110] sm:$0xff] }
 0x15f   : > { %6067 = vmatpush3.bf16.msra.mxu1 %v6064_v7  ;;  %5526 = vmatprep.mubr.msk.f32.mxu1 %vm873_vm4, %v6613_v61  ;;  %v4795_v61 = vld [vmem:[%s7701_s6 + $0x30] sm:$0xff] }
 0x160   : > { %6069 = vmatprep.subr.bf16.mxu1 %v6068_v14 }
 0x162   : > { %5527 = vmatmul.mubr.msk.f32.gmra.mrb[2].mxu1 %vm873_vm4, %v6611_v59  ;;  %v6076_v59 = vpack.c.bf16 %v4783_v48, %v4782_v47  ;;  %v4895_v47 = vld [vmem:[%s7703_s8 + $0x20] sm:$0xff]  ;;  %v4896_v48 = vld [vmem:[%s7703_s8 + $0x28] sm:$0xff] }
 0x163   : > { %5529 = vmatprep.mubr.msk.f32.mxu1 %vm873_vm4, %v6635_v10  ;;  %6071 = vmatpush3.bf16.msra.mxu1 %v6068_v14  ;;  %v2007_v10 = vld [vmem:[%s7701_s6] sm:$0xff] }
 0x164   : > { %6073 = vmatprep.subr.bf16.mxu1 %v6072_v22 }
 0x166   : > { %5530 = vmatmul.mubr.msk.f32.gmra.mrb[4].mxu1 %vm873_vm4, %v6633_v8 }
 0x167   : > { %5532 = vmatprep.mubr.f32.mxu1 %v6411_v17 }
 0x16a   : > { %5533 = vmatmul.mubr.f32.gmra.mrb[6].mxu1 %v6411_v17 }
 0x16b   : > { %5543 = vmatprep.mubr.msk.f32.mxu1 %vm873_vm4, %v6619_v0  ;;  %v4796_v0 = vld [vmem:[%s7701_s6 + $0x38] sm:$0xff] }
 0x16c   : > { %v6084_v8 = vpack.c.bf16 %v4796_v0, %v4795_v61  ;;  %v4825_v0 = vld [vmem:[%s7701_s6 + $0x60] sm:$0xff] }
 0x16e   : > { %5544 = vmatmul.mubr.msk.f32.vlgmr.msra.gmra.mrb[0].mxu1 %vm873_vm4, %v6638_v11  ;;  %6085 = vmatprep.subr.bf16.mxu0 %v6084_v8  ;;  %v2008_v11 = vld [vmem:[%s7701_s6 + $0x8] sm:$0xff] }
 0x16f   : > { %6075 = vmatpush3.bf16.msra.mxu1 %v6072_v22  ;;  %5546 = vmatprep.mubr.msk.f32.mxu1 %vm873_vm4, %v6641_v12  ;;  %v6088_v12 = vpack.c.bf16 %v2008_v11, %v2007_v10  ;;  %v4816_v22 = vld [vmem:[%s7701_s6 + $0x58] sm:$0xff] }
 0x170   : > { %6077 = vmatprep.subr.bf16.mxu1 %v6076_v59  ;;  %6087 = vmatpush3.bf16.msra.mxu0 %v6084_v8  ;;  %v6100_v61 = vpack.c.bf16 %v4816_v22, %v4815_v21  ;;  %v4826_v8 = vld [vmem:[%s7701_s6 + $0x68] sm:$0xff]  ;;  %v4882_v21 = vld [vmem:[%s7701_s6 + $0x100] sm:$0xff] }
 0x171   : > { %6089 = vmatprep.subr.bf16.mxu0 %v6088_v12  ;;  %v6104_v10 = vpack.c.bf16 %v4826_v8, %v4825_v0  ;;  %v4883_v22 = vld [vmem:[%s7701_s6 + $0x108] sm:$0xff]  ;;  %v4938_v0 = vld [vmem:[%s7703_s8 + $0x80] sm:$0xff] }
 0x172   : > { %5547 = vmatmul.mubr.msk.f32.gmra.mrb[2].mxu1 %vm873_vm4, %v6650_v15  ;;  %v4792_v15 = vld [vmem:[%s7730_s0] ss:$0 sm:$0xff]  ;;  %v4939_v8 = vld [vmem:[%s7703_s8 + $0x88] sm:$0xff] }
 0x173   : > { %5549 = vmatprep.mubr.msk.f32.mxu1 %vm873_vm4, %v6653_v16  ;;  %6079 = vmatpush3.bf16.msra.mxu1 %v6076_v59  ;;  %v6152_v59 = vpack.c.bf16 %v4896_v48, %v4895_v47  ;;  %v6144_v47 = vpack.c.bf16 %v4883_v22, %v4882_v21  ;;  %v3163_v48 = vld [vmem:[%s7703_s8] sm:$0xff] }
 0x175   : > { %6153 = vmatprep.subr.bf16.mxu1 %v6152_v59 }
 0x176   : > { %5550 = vmatmul.mubr.msk.f32.gmra.mrb[4].mxu1 %vm873_vm4, %v6664_v19 }
 0x177   : > { %5552 = vmatprep.mubr.msk.f32.mxu1 %vm873_vm4, %v6656_v18 }
 0x17a   : > { %5553 = vmatmul.mubr.msk.f32.gmra.mrb[6].mxu1 %vm873_vm4, %v6656_v18 }
 0x17b   : > { %5563 = vmatprep.mubr.msk.f32.mxu1 %vm873_vm4, %v6727_v39 }
 0x17e   : > { %5564 = vmatmul.mubr.msk.f32.vlgmr.msra.gmra.mrb[0].mxu1 %vm873_vm4, %v6733_v42 }
 0x17f   : > { %5566 = vmatprep.mubr.msk.f32.mxu1 %vm873_vm4, %v6739_v44  ;;  %6155 = vmatpush3.bf16.msra.mxu1 %v6152_v59  ;;  %v3164_v59 = vld [vmem:[%s7703_s8 + $0x8] sm:$0xff] }
 0x182   : > { %5567 = vmatmul.mubr.msk.f32.gmra.mrb[2].mxu1 %vm873_vm4, %v6745_v46 }
 0x183   : > { %5569 = vmatprep.mubr.msk.f32.mxu1 %vm873_vm4, %v6753_v50 }
 0x186   : > { %5570 = vmatmul.mubr.msk.f32.gmra.mrb[4].mxu1 %vm873_vm4, %v6759_v51 }
 0x187   : > { %5572 = vmatprep.mubr.msk.f32.mxu1 %vm873_vm4, %v6748_v49 }
 0x18a   : > { %5573 = vmatmul.mubr.msk.f32.gmra.mrb[6].mxu1 %vm873_vm4, %v6748_v49 }
 0x251   : > { %v5565_v16 = vpop.f32.mrb[0].mxu1 }
 0x252   : > { %v1992_v19 = vadd.f32 %v5565_v16, %v4792_v15  ;;  %v1937_v23 = vpop.f32.mrb[1].mxu1 }
 0x253   : > { %v1991_v24 = vadd.f32 %v4792_v15, %v1937_v23 }
 0x254   : > { %v6925_v25 = vmax.f32 %v1992_v19, 0.0 }
 0x255   : > { %v1999_v26 = vmax.f32 %v1991_v24, 0.0  ;;  %v5568_v27 = vpop.f32.mrb[2].mxu1 }
 0x256   : > { %v1994_v28 = vadd.f32 %v5568_v27, %v4792_v15  ;;  %v1947_v29 = vpop.f32.mrb[3].mxu1  ;;  %v2025_v30 = vrot.slane %v6925_v25, 1  ;;  %v2288_v31 = vrot.slane %v6925_v25, 2  ;;  %v4837_v27 = vld [vmem:[%s7701_s6 + $0x88] sm:$0xff] }
 0x257   : > { %v2024_v32 = vrot.slane %v1999_v26, 1  ;;  %v2287_v33 = vrot.slane %v1999_v26, 2  ;;  %v1993_v34 = vadd.f32 %v4792_v15, %v1947_v29 }
 0x258   : > { %v6929_v35 = vmax.f32 %v1994_v28, 0.0 }
 0x259   : > { %v6931_v36 = vmax.f32 %v1993_v34, 0.0  ;;  %v5571_v38 = vpop.f32.mrb[4].mxu1  ;;  %v2026_v39 = vsel %vm855_vm2, %v2024_v32, %v2025_v30  ;;  %v6943_v42 = vsel %vm1121_vm3, %v2287_v33, %v2288_v31 }
 0x25a   : > { %v1996_v43 = vadd.f32 %v5571_v38, %v4792_v15  ;;  %v1957_v44 = vpop.f32.mrb[5].mxu1  ;;  %5583 = vmatprep.mubr.msk.f32.mxu0 %vm873_vm4, %v2026_v39  ;;  %v2029_v45 = vrot.slane %v6929_v35, 1  ;;  %v2292_v16 = vrot.slane %v6929_v35, 2 }
 0x25b   : > { %v1995_v46 = vadd.f32 %v4792_v15, %v1957_v44  ;;  %v2027_v50 = vrot.slane %v6931_v36, 1  ;;  %v2290_v11 = vrot.slane %v6931_v36, 2  ;;  %v4848_v44 = vld [vmem:[%s7701_s6 + $0xa0] sm:$0xff] }
 0x25c   : > { %v6948_v51 = vmax.f32 %v1996_v43, 0.0 }
 0x25d   : > { %v6950_v53 = vmax.f32 %v1995_v46, 0.0  ;;  %v5574_v54 = vpop.f32.mrb[6].mxu1  ;;  %v6953_v55 = vsel %vm855_vm2, %v2025_v30, %v2027_v50  ;;  %v6956_v56 = vsel %vm855_vm2, %v2027_v50, %v2029_v45  ;;  %v7048_v23 = vsel %vm1121_vm3, %v2288_v31, %v2290_v11  ;;  %v4851_v50 = vld [vmem:[%s7701_s6 + $0xb8] sm:$0xff] }
 0x25e   : > { %v1998_v58 = vadd.f32 %v5574_v54, %v4792_v15  ;;  %v1967_v60 = vpop.f32.mrb[7].mxu1  ;;  %5584 = vmatmul.mubr.msk.f32.vlgmr.msra.gmra.mrb[8].mxu0 %vm873_vm4, %v6953_v55  ;;  %v2033_v62 = vrot.slane %v6948_v51, 1  ;;  %v7060_v28 = vsel %vm1121_vm3, %v2290_v11, %v2292_v16  ;;  %v2296_v29 = vrot.slane %v6948_v51, 2  ;;  %v4860_v54 = vld [vmem:[%s7701_s6 + $0xc0] sm:$0xff] }
 0x25f   : > { %v1997_v1 = vadd.f32 %v4792_v15, %v1967_v60  ;;  %6091 = vmatpush3.bf16.msra.mxu0 %v6088_v12  ;;  %5586 = vmatprep.mubr.msk.f32.mxu0 %vm873_vm4, %v6956_v56  ;;  %v2031_v2 = vrot.slane %v6950_v53, 1  ;;  %v4827_v12 = vld [vmem:[%s7701_s6 + $0x70] sm:$0xff]  ;;  %v4828_v15 = vld [vmem:[%s7701_s6 + $0x78] sm:$0xff]  ;;  %v2294_v24 = vrot.slane %v6950_v53, 2  ;;  %v6128_v37 = vpack.c.bf16 %v4861_v57, %v4860_v54  ;;  %v4894_v11 = vld [vmem:[%s7702_s7] ss:$0 sm:$0xff] }
 0x260   : > { %v6970_v63 = vmax.f32 %v1998_v58, 0.0  ;;  %6093 = vmatprep.subr.bf16.mxu0 %v6092_v52  ;;  %v6108_v19 = vpack.c.bf16 %v4828_v15, %v4827_v12  ;;  %v4863_v58 = vld [vmem:[%s7701_s6 + $0xd8] sm:$0xff] }
 0x261   : > { %v6972_v4 = vmax.f32 %v1997_v1, 0.0  ;;  %v6975_v5 = vsel %vm855_vm2, %v2029_v45, %v2031_v2  ;;  %v6978_v6 = vsel %vm855_vm2, %v2031_v2, %v2033_v62  ;;  %v7066_v31 = vsel %vm1121_vm3, %v2292_v16, %v2294_v24  ;;  %v4849_v45 = vld [vmem:[%s7701_s6 + $0xa8] sm:$0xff] }
 0x262   : > { %5587 = vmatmul.mubr.msk.f32.gmra.mrb[10].mxu0 %vm873_vm4, %v6975_v5  ;;  %v2037_v7 = vrot.slane %v6970_v63, 1  ;;  %v7072_v33 = vsel %vm1121_vm3, %v2294_v24, %v2296_v29  ;;  %v2300_v34 = vrot.slane %v6970_v63, 2  ;;  %v6120_v46 = vpack.c.bf16 %v4849_v45, %v4848_v44  ;;  %v4871_v1 = vld [vmem:[%s7701_s6 + $0xe8] sm:$0xff] }
 0x263   : > { %5589 = vmatprep.mubr.msk.f32.mxu0 %vm873_vm4, %v6978_v6  ;;  %v2035_v9 = vrot.slane %v6972_v4, 1  ;;  %6095 = vmatpush3.bf16.msra.mxu0 %v6092_v52  ;;  %v2298_v32 = vrot.slane %v6972_v4, 2 }
 0x264   : > { %6097 = vmatprep.subr.bf16.mxu0 %v6096_v3  ;;  %v6998_v20 = vsel %vm855_vm2, %v2037_v7, %v6656_v18  ;;  %v7089_v40 = vsel %vm1121_vm3, %v2300_v34, %v6748_v49 }
 0x265   : > { %v6987_v13 = vsel %vm855_vm2, %v2033_v62, %v2035_v9  ;;  %v6990_v14 = vsel %vm855_vm2, %v2035_v9, %v2037_v7  ;;  %v7078_v38 = vsel %vm1121_vm3, %v2296_v29, %v2298_v32  ;;  %v7083_v39 = vsel %vm1121_vm3, %v2298_v32, %v2300_v34  ;;  %v4870_v62 = vld [vmem:[%s7701_s6 + $0xe0] sm:$0xff]  ;;  %v4873_v7 = vld [vmem:[%s7701_s6 + $0xf8] sm:$0xff] }
 0x266   : > { %5590 = vmatmul.mubr.msk.f32.gmra.mrb[12].mxu0 %vm873_vm4, %v6987_v13  ;;  %v6136_v2 = vpack.c.bf16 %v4871_v1, %v4870_v62 }
 0x267   : > { %5592 = vmatprep.mubr.msk.f32.mxu0 %vm873_vm4, %v6990_v14 }
 0x26a   : > { %5593 = vmatmul.mubr.msk.f32.gmra.mrb[14].mxu0 %vm873_vm4, %v6998_v20 }
 0x26b   : > { %5603 = vmatprep.mubr.msk.f32.mxu0 %vm873_vm4, %v1999_v26  ;;  %v4836_v26 = vld [vmem:[%s7701_s6 + $0x80] sm:$0xff] }
 0x26c   : > { %v6112_v30 = vpack.c.bf16 %v4837_v27, %v4836_v26 }
 0x26e   : > { %5604 = vmatmul.mubr.msk.f32.vlgmr.msra.gmra.mrb[8].mxu0 %vm873_vm4, %v6925_v25 }
 0x26f   : > { %6099 = vmatpush3.bf16.msra.mxu0 %v6096_v3  ;;  %5606 = vmatprep.mubr.msk.f32.mxu0 %vm873_vm4, %v6931_v36  ;;  %v4872_v3 = vld [vmem:[%s7701_s6 + $0xf0] sm:$0xff] }
 0x270   : > { %6101 = vmatprep.subr.bf16.mxu0 %v6100_v61  ;;  %v6140_v9 = vpack.c.bf16 %v4873_v7, %v4872_v3  ;;  %v4941_v3 = vld [vmem:[%s7703_s8 + $0x98] sm:$0xff] }
 0x272   : > { %5607 = vmatmul.mubr.msk.f32.gmra.mrb[10].mxu0 %vm873_vm4, %v6929_v35 }
 0x273   : > { %5609 = vmatprep.mubr.msk.f32.mxu0 %vm873_vm4, %v6950_v53  ;;  %6103 = vmatpush3.bf16.msra.mxu0 %v6100_v61  ;;  %v6160_v61 = vpack.c.bf16 %v3164_v59, %v3163_v48  ;;  %v4963_v48 = vld [vmem:[%s7703_s8 + $0xc8] sm:$0xff] }
 0x274   : > { %6105 = vmatprep.subr.bf16.mxu0 %v6104_v10 }
 0x276   : > { %5610 = vmatmul.mubr.msk.f32.gmra.mrb[12].mxu0 %vm873_vm4, %v6948_v51 }
 0x277   : > { %5612 = vmatprep.mubr.msk.f32.mxu0 %vm873_vm4, %v6972_v4 }
 0x27a   : > { %5613 = vmatmul.mubr.msk.f32.gmra.mrb[14].mxu0 %vm873_vm4, %v6970_v63 }
 0x27b   : > { %5623 = vmatprep.mubr.msk.f32.mxu0 %vm873_vm4, %v6943_v42  ;;  %v4839_v42 = vld [vmem:[%s7701_s6 + $0x98] sm:$0xff] }
 0x27c   : > { %v6116_v43 = vpack.c.bf16 %v4839_v42, %v4838_v41  ;;  %v3165_v42 = vld [vmem:[%s7703_s8 + $0x10] sm:$0xff] }
 0x27e   : > { %5624 = vmatmul.mubr.msk.f32.vlgmr.msra.gmra.mrb[8].mxu0 %vm873_vm4, %v7048_v23 }
 0x27f   : > { %6107 = vmatpush3.bf16.msra.mxu0 %v6104_v10  ;;  %5626 = vmatprep.mubr.msk.f32.mxu0 %vm873_vm4, %v7060_v28  ;;  %v7270_v10 = vpack.c.bf16 %v4939_v8, %v4938_v0 }
 0x280   : > { %6109 = vmatprep.subr.bf16.mxu0 %v6108_v19 }
 0x282   : > { %5627 = vmatmul.mubr.msk.f32.gmra.mrb[10].mxu0 %vm873_vm4, %v7066_v31 }
 0x283   : > { %5629 = vmatprep.mubr.msk.f32.mxu0 %vm873_vm4, %v7072_v33  ;;  %6111 = vmatpush3.bf16.msra.mxu0 %v6108_v19 }
 0x284   : > { %6113 = vmatprep.subr.bf16.mxu0 %v6112_v30 }
 0x286   : > { %5630 = vmatmul.mubr.msk.f32.gmra.mrb[12].mxu0 %vm873_vm4, %v7078_v38 }
 0x287   : > { %5632 = vmatprep.mubr.msk.f32.mxu0 %vm873_vm4, %v7083_v39 }
 0x28a   : > { %5633 = vmatmul.mubr.msk.f32.gmra.mrb[14].mxu0 %vm873_vm4, %v7089_v40 }
 0x28b   : > { %5643 = vmatprep.mubr.msk.f32.mxu0 %vm873_vm4, %v6925_v25  ;;  %v4850_v25 = vld [vmem:[%s7701_s6 + $0xb0] sm:$0xff] }
 0x28c   : > { %v6124_v52 = vpack.c.bf16 %v4851_v50, %v4850_v25 }
 0x28e   : > { %5644 = vmatmul.mubr.msk.f32.vlgmr.msra.gmra.mrb[8].mxu0 %vm873_vm4, %v6931_v36 }
 0x28f   : > { %6115 = vmatpush3.bf16.msra.mxu0 %v6112_v30  ;;  %5646 = vmatprep.mubr.msk.f32.mxu0 %vm873_vm4, %v6929_v35 }
 0x290   : > { %6117 = vmatprep.subr.bf16.mxu0 %v6116_v43 }
 0x292   : > { %5647 = vmatmul.mubr.msk.f32.gmra.mrb[10].mxu0 %vm873_vm4, %v6950_v53 }
 0x293   : > { %5649 = vmatprep.mubr.msk.f32.mxu0 %vm873_vm4, %v6948_v51  ;;  %6119 = vmatpush3.bf16.msra.mxu0 %v6116_v43  ;;  %v3166_v43 = vld [vmem:[%s7703_s8 + $0x18] sm:$0xff] }
 0x294   : > { %6121 = vmatprep.subr.bf16.mxu0 %v6120_v46 }
 0x296   : > { %5650 = vmatmul.mubr.msk.f32.gmra.mrb[12].mxu0 %vm873_vm4, %v6972_v4 }
 0x297   : > { %5652 = vmatprep.mubr.msk.f32.mxu0 %vm873_vm4, %v6970_v63 }
 0x29a   : > { %5653 = vmatmul.mubr.f32.gmra.mrb[14].mxu0 %v6411_v17 }
 0x29b   : > { %5663 = vmatprep.mubr.msk.f32.mxu0 %vm873_vm4, %v6953_v55  ;;  %v4862_v55 = vld [vmem:[%s7701_s6 + $0xd0] sm:$0xff] }
 0x29c   : > { %v6132_v60 = vpack.c.bf16 %v4863_v58, %v4862_v55 }
 0x29e   : > { %5664 = vmatmul.mubr.msk.f32.vlgmr.msra.gmra.mrb[8].mxu0 %vm873_vm4, %v6956_v56 }
 0x29f   : > { %6123 = vmatpush3.bf16.msra.mxu0 %v6120_v46  ;;  %5666 = vmatprep.mubr.msk.f32.mxu0 %vm873_vm4, %v6975_v5 }
 0x2a0   : > { %6125 = vmatprep.subr.bf16.mxu0 %v6124_v52 }
 0x2a2   : > { %5667 = vmatmul.mubr.msk.f32.gmra.mrb[10].mxu0 %vm873_vm4, %v6978_v6 }
 0x2a3   : > { %5669 = vmatprep.mubr.msk.f32.mxu0 %vm873_vm4, %v6987_v13  ;;  %6127 = vmatpush3.bf16.msra.mxu0 %v6124_v52 }
 0x2a4   : > { %6129 = vmatprep.subr.bf16.mxu0 %v6128_v37 }
 0x2a6   : > { %5670 = vmatmul.mubr.msk.f32.gmra.mrb[12].mxu0 %vm873_vm4, %v6990_v14 }
 0x2a7   : > { %5672 = vmatprep.mubr.msk.f32.mxu0 %vm873_vm4, %v6998_v20 }
 0x2aa   : > { %5673 = vmatmul.mubr.msk.f32.gmra.mrb[14].mxu0 %vm873_vm4, %v6656_v18 }
 0x2ab   : > { %5683 = vmatprep.mubr.msk.f32.mxu0 %vm873_vm4, %v7048_v23 }
 0x2ae   : > { %5684 = vmatmul.mubr.msk.f32.vlgmr.msra.gmra.mrb[8].mxu0 %vm873_vm4, %v7060_v28 }
 0x2af   : > { %6131 = vmatpush3.bf16.msra.mxu0 %v6128_v37  ;;  %5686 = vmatprep.mubr.msk.f32.mxu0 %vm873_vm4, %v7066_v31  ;;  %v6164_v37 = vpack.c.bf16 %v3166_v43, %v3165_v42  ;;  %v4984_v42 = vld [vmem:[%s7703_s8 + $0x100] sm:$0xff]  ;;  %v4985_v43 = vld [vmem:[%s7703_s8 + $0x108] sm:$0xff] }
 0x2b0   : > { %6133 = vmatprep.subr.bf16.mxu0 %v6132_v60 }
 0x2b2   : > { %5687 = vmatmul.mubr.msk.f32.gmra.mrb[10].mxu0 %vm873_vm4, %v7072_v33 }
 0x2b3   : > { %5689 = vmatprep.mubr.msk.f32.mxu0 %vm873_vm4, %v7078_v38  ;;  %6135 = vmatpush3.bf16.msra.mxu0 %v6132_v60 }
 0x2b4   : > { %6137 = vmatprep.subr.bf16.mxu0 %v6136_v2 }
 0x2b6   : > { %5690 = vmatmul.mubr.msk.f32.gmra.mrb[12].mxu0 %vm873_vm4, %v7083_v39 }
 0x2b7   : > { %5692 = vmatprep.mubr.msk.f32.mxu0 %vm873_vm4, %v7089_v40 }
 0x2ba   : > { %5693 = vmatmul.mubr.msk.f32.gmra.mrb[14].mxu0 %vm873_vm4, %v6748_v49 }
 0x2bb   : > { %5703 = vmatprep.mubr.msk.f32.mxu0 %vm873_vm4, %v6931_v36  ;;  %v4885_v36 = vld [vmem:[%s7701_s6 + $0x118] sm:$0xff] }
 0x2be   : > { %5704 = vmatmul.mubr.msk.f32.vlgmr.msra.gmra.mrb[8].mxu0 %vm873_vm4, %v6929_v35  ;;  %v4884_v35 = vld [vmem:[%s7701_s6 + $0x110] sm:$0xff] }
 0x2bf   : > { %6139 = vmatpush3.bf16.msra.mxu0 %v6136_v2  ;;  %5706 = vmatprep.mubr.msk.f32.mxu0 %vm873_vm4, %v6950_v53  ;;  %v4915_v53 = vld [vmem:[%s7703_s8 + $0x40] sm:$0xff]  ;;  %v4940_v2 = vld [vmem:[%s7703_s8 + $0x90] sm:$0xff] }
 0x2c0   : > { %6141 = vmatprep.subr.bf16.mxu0 %v6140_v9 }
 0x2c2   : > { %5707 = vmatmul.mubr.msk.f32.gmra.mrb[10].mxu0 %vm873_vm4, %v6948_v51  ;;  %v6148_v51 = vpack.c.bf16 %v4885_v36, %v4884_v35 }
 0x2c3   : > { %5709 = vmatprep.mubr.msk.f32.mxu0 %vm873_vm4, %v6972_v4  ;;  %6143 = vmatpush3.bf16.msra.mxu0 %v6140_v9  ;;  %v4897_v4 = vld [vmem:[%s7703_s8 + $0x30] sm:$0xff] }
 0x2c4   : > { %6145 = vmatprep.subr.bf16.mxu0 %v6144_v47 }
 0x2c6   : > { %5710 = vmatmul.mubr.msk.f32.gmra.mrb[12].mxu0 %vm873_vm4, %v6970_v63 }
 0x2c7   : > { %5712 = vmatprep.mubr.f32.mxu0 %v6411_v17 }
 0x2ca   : > { %5713 = vmatmul.mubr.f32.gmra.mrb[14].mxu0 %v6411_v17 }
 0x2cb   : > { %5723 = vmatprep.mubr.msk.f32.mxu0 %vm873_vm4, %v6956_v56  ;;  %v4916_v56 = vld [vmem:[%s7703_s8 + $0x48] sm:$0xff] }
 0x2cc   : > { %v6168_v63 = vpack.c.bf16 %v4916_v56, %v4915_v53  ;;  %v6188_v56 = vpack.c.bf16 %v4941_v3, %v4940_v2 }
 0x2ce   : > { %5724 = vmatmul.mubr.msk.f32.vlgmr.msra.gmra.mrb[8].mxu0 %vm873_vm4, %v6975_v5  ;;  %v4898_v5 = vld [vmem:[%s7703_s8 + $0x38] sm:$0xff] }
 0x2cf   : > { %6147 = vmatpush3.bf16.msra.mxu0 %v6144_v47  ;;  %5726 = vmatprep.mubr.msk.f32.mxu0 %vm873_vm4, %v6978_v6  ;;  %v4917_v6 = vld [vmem:[%s7703_s8 + $0x50] sm:$0xff] }
 0x2d0   : > { %6149 = vmatprep.subr.bf16.mxu0 %v6148_v51 }
 0x2d2   : > { %5727 = vmatmul.mubr.msk.f32.gmra.mrb[10].mxu0 %vm873_vm4, %v6987_v13  ;;  %v6156_v13 = vpack.c.bf16 %v4898_v5, %v4897_v4 }
 0x2d3   : > { %5729 = vmatprep.mubr.msk.f32.mxu0 %vm873_vm4, %v6990_v14  ;;  %6151 = vmatpush3.bf16.msra.mxu0 %v6148_v51  ;;  %v4918_v14 = vld [vmem:[%s7703_s8 + $0x58] sm:$0xff] }
 0x2d4   : > { %6169 = vmatprep.subr.bf16.mxu0 %v6168_v63  ;;  %6157 = vmatprep.subr.bf16.mxu1 %v6156_v13 }
 0x2d5   : > { %6159 = vmatpush3.bf16.msra.mxu1 %v6156_v13 }
 0x2d6   : > { %5730 = vmatmul.mubr.msk.f32.gmra.mrb[12].mxu0 %vm873_vm4, %v6998_v20  ;;  %v6172_v20 = vpack.c.bf16 %v4918_v14, %v4917_v6  ;;  %6161 = vmatprep.subr.bf16.mxu1 %v6160_v61  ;;  %v4928_v14 = vld [vmem:[%s7703_s8 + $0x68] sm:$0xff] }
 0x2d7   : > { %5732 = vmatprep.mubr.msk.f32.mxu0 %vm873_vm4, %v6656_v18 }
 0x2da   : > { %5733 = vmatmul.mubr.msk.f32.gmra.mrb[14].mxu0 %vm873_vm4, %v6656_v18 }
 0x2db   : > { %5743 = vmatprep.mubr.msk.f32.mxu0 %vm873_vm4, %v7060_v28 }
 0x2de   : > { %5744 = vmatmul.mubr.msk.f32.vlgmr.msra.gmra.mrb[8].mxu0 %vm873_vm4, %v7066_v31 }
 0x2df   : > { %5746 = vmatprep.mubr.msk.f32.mxu0 %vm873_vm4, %v7072_v33  ;;  %6171 = vmatpush3.bf16.msra.mxu0 %v6168_v63  ;;  %v4927_v63 = vld [vmem:[%s7703_s8 + $0x60] sm:$0xff] }
 0x2e0   : > { %6173 = vmatprep.subr.bf16.mxu0 %v6172_v20 }
 0x2e2   : > { %5747 = vmatmul.mubr.msk.f32.gmra.mrb[10].mxu0 %vm873_vm4, %v7078_v38 }
 0x2e3   : > { %5749 = vmatprep.mubr.msk.f32.mxu0 %vm873_vm4, %v7083_v39  ;;  %6175 = vmatpush3.bf16.msra.mxu0 %v6172_v20  ;;  %v4962_v20 = vld [vmem:[%s7703_s8 + $0xc0] sm:$0xff] }
 0x2e4   : > { %6185 = vmatprep.subr.bf16.mxu0 %v7270_v10 }
 0x2e6   : > { %5750 = vmatmul.mubr.msk.f32.gmra.mrb[12].mxu0 %vm873_vm4, %v7089_v40 }
 0x2e7   : > { %5752 = vmatprep.mubr.msk.f32.mxu0 %vm873_vm4, %v6748_v49 }
 0x2ea   : > { %5753 = vmatmul.mubr.msk.f32.gmra.mrb[14].mxu0 %vm873_vm4, %v6748_v49 }
 0x3b1   : > { %v5745_v12 = vpop.f32.mrb[8].mxu0 }
 0x3b2   : > { %v3148_v15 = vadd.f32 %v5745_v12, %v4894_v11  ;;  %v3093_v16 = vpop.f32.mrb[9].mxu0  ;;  %v6200_v12 = vpack.c.bf16 %v4963_v48, %v4962_v20 }
 0x3b3   : > { %v3147_v19 = vadd.f32 %v4894_v11, %v3093_v16 }
 0x3b4   : > { %v7276_v23 = vmax.f32 %v3148_v15, 0.0 }
 0x3b5   : > { %v7278_v24 = vmax.f32 %v3147_v19, 0.0  ;;  %v5748_v26 = vpop.f32.mrb[10].mxu0 }
 0x3b6   : > { %v3150_v27 = vadd.f32 %v5748_v26, %v4894_v11  ;;  %v3103_v28 = vpop.f32.mrb[11].mxu0  ;;  %v3181_v29 = vrot.slane %v7276_v23, 1  ;;  %v3430_v30 = vrot.slane %v7276_v23, 2 }
 0x3b7   : > { %v3180_v31 = vrot.slane %v7278_v24, 1  ;;  %v3429_v32 = vrot.slane %v7278_v24, 2  ;;  %v3149_v33 = vadd.f32 %v4894_v11, %v3103_v28 }
 0x3b8   : > { %v7284_v34 = vmax.f32 %v3150_v27, 0.0 }
 0x3b9   : > { %v7286_v38 = vmax.f32 %v3149_v33, 0.0  ;;  %v5751_v39 = vpop.f32.mrb[12].mxu0  ;;  %v3182_v40 = vsel %vm855_vm2, %v3180_v31, %v3181_v29  ;;  %v3431_v41 = vsel %vm1121_vm3, %v3429_v32, %v3430_v30  ;;  %v4964_v32 = vld [vmem:[%s7703_s8 + $0xd0] sm:$0xff]  ;;  %v4965_v33 = vld [vmem:[%s7703_s8 + $0xd8] sm:$0xff] }
 0x3ba   : > { %v3152_v44 = vadd.f32 %v5751_v39, %v4894_v11  ;;  %v3113_v45 = vpop.f32.mrb[13].mxu0  ;;  %5763 = vmatprep.mubr.msk.f32.mxu1 %vm873_vm4, %v3182_v40  ;;  %5803 = vmatprep.mubr.msk.f32.mxu0 %vm873_vm4, %v3431_v41  ;;  %v3185_v46 = vrot.slane %v7284_v34, 1  ;;  %v3434_v25 = vrot.slane %v7284_v34, 2  ;;  %v4951_v39 = vld [vmem:[%s7703_s8 + $0xa8] sm:$0xff]  ;;  %v6204_v40 = vpack.c.bf16 %v4965_v33, %v4964_v32 }
 0x3bb   : > { %v3151_v50 = vadd.f32 %v4894_v11, %v3113_v45  ;;  %v3183_v52 = vrot.slane %v7286_v38, 1  ;;  %v3432_v54 = vrot.slane %v7286_v38, 2  ;;  %v4952_v45 = vld [vmem:[%s7703_s8 + $0xb0] sm:$0xff] }
 0x3bc   : > { %v7302_v57 = vmax.f32 %v3152_v44, 0.0  ;;  %v6216_v44 = vpack.c.bf16 %v4985_v43, %v4984_v42 }
 0x3bd   : > { %v7304_v55 = vmax.f32 %v3151_v50, 0.0  ;;  %v5754_v58 = vpop.f32.mrb[14].mxu0  ;;  %v3184_v60 = vsel %vm855_vm2, %v3181_v29, %v3183_v52  ;;  %v7308_v62 = vsel %vm1121_vm3, %v3430_v30, %v3432_v54  ;;  %v7311_v1 = vsel %vm855_vm2, %v3183_v52, %v3185_v46  ;;  %v4929_v29 = vld [vmem:[%s7703_s8 + $0x70] sm:$0xff]  ;;  %v4930_v30 = vld [vmem:[%s7703_s8 + $0x78] sm:$0xff] }
 0x3be   : > { %v3154_v7 = vadd.f32 %v5754_v58, %v4894_v11  ;;  %v3123_v9 = vpop.f32.mrb[15].mxu0  ;;  %5764 = vmatmul.mubr.msk.f32.vlgmr.msra.gmra.mrb[8].mxu1 %vm873_vm4, %v3184_v60  ;;  %5804 = vmatmul.mubr.msk.f32.vlgmr.msra.gmra.mrb[16].mxu0 %vm873_vm4, %v7308_v62  ;;  %v7323_v21 = vsel %vm1121_vm3, %v3432_v54, %v3434_v25  ;;  %v3189_v22 = vrot.slane %v7302_v57, 1  ;;  %v3438_v47 = vrot.slane %v7302_v57, 2  ;;  %v4986_v50 = vld [vmem:[%s7703_s8 + $0x110] sm:$0xff]  ;;  %v4987_v52 = vld [vmem:[%s7703_s8 + $0x118] sm:$0xff]  ;;  %v4973_v54 = vld [vmem:[%s7703_s8 + $0xe8] sm:$0xff] }
 0x3bf   : > { %v3153_v35 = vadd.f32 %v4894_v11, %v3123_v9  ;;  %6163 = vmatpush3.bf16.msra.mxu1 %v6160_v61  ;;  %5766 = vmatprep.mubr.msk.f32.mxu1 %vm873_vm4, %v7311_v1  ;;  %v3187_v36 = vrot.slane %v7304_v55, 1  ;;  %v3436_v51 = vrot.slane %v7304_v55, 2  ;;  %v6176_v11 = vpack.c.bf16 %v4928_v14, %v4927_v63  ;;  %v4194_v58 = vld [vmem:[%s7705_s10 + $0x8] sm:$0xff] }
 0x3c0   : > { %v7331_v53 = vmax.f32 %v3154_v7, 0.0  ;;  %5806 = vmatprep.mubr.msk.f32.mxu0 %vm873_vm4, %v7323_v21  ;;  %6165 = vmatprep.subr.bf16.mxu1 %v6164_v37  ;;  %v6180_v31 = vpack.c.bf16 %v4930_v30, %v4929_v29 }
 0x3c1   : > { %v7338_v4 = vmax.f32 %v3153_v35, 0.0  ;;  %v7341_v5 = vsel %vm855_vm2, %v3185_v46, %v3187_v36  ;;  %v7344_v6 = vsel %vm1121_vm3, %v3434_v25, %v3436_v51  ;;  %v7347_v13 = vsel %vm855_vm2, %v3187_v36, %v3189_v22  ;;  %6187 = vmatpush3.bf16.msra.mxu0 %v7270_v10  ;;  %v4953_v46 = vld [vmem:[%s7703_s8 + $0xb8] sm:$0xff] }
 0x3c2   : > { %5767 = vmatmul.mubr.msk.f32.gmra.mrb[10].mxu1 %vm873_vm4, %v7341_v5  ;;  %5807 = vmatmul.mubr.msk.f32.gmra.mrb[18].mxu0 %vm873_vm4, %v7344_v6  ;;  %v7364_v59 = vsel %vm1121_vm3, %v3436_v51, %v3438_v47  ;;  %v3193_v61 = vrot.slane %v7331_v53, 1  ;;  %v3442_v0 = vrot.slane %v7331_v53, 2  ;;  %v6196_v25 = vpack.c.bf16 %v4953_v46, %v4952_v45 }
 0x3c3   : > { %5769 = vmatprep.mubr.msk.f32.mxu1 %vm873_vm4, %v7347_v13  ;;  %5809 = vmatprep.mubr.msk.f32.mxu0 %vm873_vm4, %v7364_v59  ;;  %v3191_v8 = vrot.slane %v7338_v4, 1  ;;  %v3440_v10 = vrot.slane %v7338_v4, 2 }
 0x3c4   : > { %6167 = vmatpush3.bf16.msra.mxu1 %v6164_v37  ;;  %6189 = vmatprep.subr.bf16.mxu0 %v6188_v56  ;;  %v7396_v27 = vsel %vm855_vm2, %v3193_v61, %v6656_v18  ;;  %v7400_v28 = vsel %vm1121_vm3, %v3442_v0, %v6748_v49 }
 0x3c5   : > { %v7375_v15 = vsel %vm855_vm2, %v3189_v22, %v3191_v8  ;;  %v7378_v16 = vsel %vm1121_vm3, %v3438_v47, %v3440_v10  ;;  %v7381_v19 = vsel %vm855_vm2, %v3191_v8, %v3193_v61  ;;  %v7384_v26 = vsel %vm1121_vm3, %v3440_v10, %v3442_v0  ;;  %6191 = vmatpush3.bf16.msra.mxu0 %v6188_v56 }
 0x3c6   : > { %5770 = vmatmul.mubr.msk.f32.gmra.mrb[12].mxu1 %vm873_vm4, %v7375_v15  ;;  %5810 = vmatmul.mubr.msk.f32.gmra.mrb[20].mxu0 %vm873_vm4, %v7378_v16 }
 0x3c7   : > { %5772 = vmatprep.mubr.msk.f32.mxu1 %vm873_vm4, %v7381_v19  ;;  %5812 = vmatprep.mubr.msk.f32.mxu0 %vm873_vm4, %v7384_v26 }
 0x3c8   : > { %6177 = vmatprep.subr.bf16.mxu1 %v6176_v11  ;;  %6201 = vmatprep.subr.bf16.mxu0 %v6200_v12 }
 0x3ca   : > { %5773 = vmatmul.mubr.msk.f32.gmra.mrb[14].mxu1 %vm873_vm4, %v7396_v27  ;;  %5813 = vmatmul.mubr.msk.f32.gmra.mrb[22].mxu0 %vm873_vm4, %v7400_v28 }
 0x3cb   : > { %5783 = vmatprep.mubr.msk.f32.mxu1 %vm873_vm4, %v7278_v24  ;;  %5843 = vmatprep.mubr.msk.f32.mxu0 %vm873_vm4, %v3184_v60  ;;  %v4950_v24 = vld [vmem:[%s7703_s8 + $0xa0] sm:$0xff]  ;;  %v6412_v60 = vmov 0.0|0.0  }
 0x3cc   : > { %v6192_v41 = vpack.c.bf16 %v4951_v39, %v4950_v24 }
 0x3ce   : > { %5784 = vmatmul.mubr.msk.f32.vlgmr.msra.gmra.mrb[16].mxu1 %vm873_vm4, %v7276_v23  ;;  %5844 = vmatmul.mubr.msk.f32.vlgmr.msra.gmra.mrb[24].mxu0 %vm873_vm4, %v7311_v1 }
 0x3cf   : > { %6179 = vmatpush3.bf16.msra.mxu1 %v6176_v11  ;;  %5786 = vmatprep.mubr.msk.f32.mxu1 %vm873_vm4, %v7286_v38 }
 0x3d0   : > { %5846 = vmatprep.mubr.msk.f32.mxu0 %vm873_vm4, %v7341_v5  ;;  %6181 = vmatprep.subr.bf16.mxu1 %v6180_v31 }
 0x3d1   : > { %6203 = vmatpush3.bf16.msra.mxu0 %v6200_v12 }
 0x3d2   : > { %5787 = vmatmul.mubr.msk.f32.gmra.mrb[18].mxu1 %vm873_vm4, %v7284_v34  ;;  %5847 = vmatmul.mubr.msk.f32.gmra.mrb[26].mxu0 %vm873_vm4, %v7347_v13 }
 0x3d3   : > { %5789 = vmatprep.mubr.msk.f32.mxu1 %vm873_vm4, %v7304_v55  ;;  %5849 = vmatprep.mubr.msk.f32.mxu0 %vm873_vm4, %v7375_v15 }
 0x3d4   : > { %6183 = vmatpush3.bf16.msra.mxu1 %v6180_v31  ;;  %6205 = vmatprep.subr.bf16.mxu0 %v6204_v40 }
 0x3d5   : > { %6207 = vmatpush3.bf16.msra.mxu0 %v6204_v40  ;;  %6193 = vmatprep.subr.bf16.mxu1 %v6192_v41 }
 0x3d6   : > { %5790 = vmatmul.mubr.msk.f32.gmra.mrb[20].mxu1 %vm873_vm4, %v7302_v57  ;;  %5850 = vmatmul.mubr.msk.f32.gmra.mrb[28].mxu0 %vm873_vm4, %v7381_v19 }
 0x3d7   : > { %5792 = vmatprep.mubr.msk.f32.mxu1 %vm873_vm4, %v7338_v4  ;;  %5852 = vmatprep.mubr.msk.f32.mxu0 %vm873_vm4, %v7396_v27 }
 0x3d8   : > { %6217 = vmatprep.subr.bf16.mxu0 %v6216_v44 }
 0x3da   : > { %5793 = vmatmul.mubr.msk.f32.gmra.mrb[22].mxu1 %vm873_vm4, %v7331_v53  ;;  %5853 = vmatmul.mubr.msk.f32.gmra.mrb[30].mxu0 %vm873_vm4, %v6656_v18 }
 0x3db   : > { %5823 = vmatprep.mubr.msk.f32.mxu1 %vm873_vm4, %v7276_v23  ;;  %5883 = vmatprep.mubr.msk.f32.mxu0 %vm873_vm4, %v7286_v38  ;;  %v4972_v23 = vld [vmem:[%s7703_s8 + $0xe0] sm:$0xff] }
 0x3dc   : > { %v6208_v37 = vpack.c.bf16 %v4973_v54, %v4972_v23 }
 0x3de   : > { %5824 = vmatmul.mubr.msk.f32.vlgmr.msra.gmra.mrb[24].mxu1 %vm873_vm4, %v7286_v38  ;;  %5884 = vmatmul.mubr.msk.f32.vlgmr.msra.gmra.mrb[32].mxu0 %vm873_vm4, %v7284_v34  ;;  %v6220_v38 = vpack.c.bf16 %v4987_v52, %v4986_v50 }
 0x3df   : > { %6195 = vmatpush3.bf16.msra.mxu1 %v6192_v41  ;;  %5826 = vmatprep.mubr.msk.f32.mxu1 %vm873_vm4, %v7284_v34  ;;  %v4974_v34 = vld [vmem:[%s7703_s8 + $0xf0] sm:$0xff] }
 0x3e0   : > { %5886 = vmatprep.mubr.msk.f32.mxu0 %vm873_vm4, %v7304_v55  ;;  %6197 = vmatprep.subr.bf16.mxu1 %v6196_v25 }
 0x3e1   : > { %6219 = vmatpush3.bf16.msra.mxu0 %v6216_v44 }
 0x3e2   : > { %5827 = vmatmul.mubr.msk.f32.gmra.mrb[26].mxu1 %vm873_vm4, %v7304_v55  ;;  %5887 = vmatmul.mubr.msk.f32.gmra.mrb[34].mxu0 %vm873_vm4, %v7302_v57 }
 0x3e3   : > { %5829 = vmatprep.mubr.msk.f32.mxu1 %vm873_vm4, %v7302_v57  ;;  %5889 = vmatprep.mubr.msk.f32.mxu0 %vm873_vm4, %v7338_v4  ;;  %v4975_v57 = vld [vmem:[%s7703_s8 + $0xf8] sm:$0xff] }
 0x3e4   : > { %6199 = vmatpush3.bf16.msra.mxu1 %v6196_v25  ;;  %6221 = vmatprep.subr.bf16.mxu0 %v6220_v38  ;;  %v6212_v55 = vpack.c.bf16 %v4975_v57, %v4974_v34 }
 0x3e5   : > { %6223 = vmatpush3.bf16.msra.mxu0 %v6220_v38  ;;  %6209 = vmatprep.subr.bf16.mxu1 %v6208_v37 }
 0x3e6   : > { %5830 = vmatmul.mubr.msk.f32.gmra.mrb[28].mxu1 %vm873_vm4, %v7338_v4  ;;  %5890 = vmatmul.mubr.msk.f32.gmra.mrb[36].mxu0 %vm873_vm4, %v7331_v53 }
 0x3e7   : > { %5832 = vmatprep.mubr.msk.f32.mxu1 %vm873_vm4, %v7331_v53  ;;  %5892 = vmatprep.mubr.f32.mxu0 %v6411_v17 }
 0x3e8   : > { %6224 = vmatprep.subr.bf16.mxu0 %v6412_v60 }
 0x3ea   : > { %5833 = vmatmul.mubr.f32.gmra.mrb[30].mxu1 %v6411_v17  ;;  %5893 = vmatmul.mubr.f32.gmra.mrb[38].mxu0 %v6411_v17 }
 0x3eb   : > { %5863 = vmatprep.mubr.msk.f32.mxu1 %vm873_vm4, %v7308_v62  ;;  %5923 = vmatprep.mubr.msk.f32.mxu0 %vm873_vm4, %v7323_v21 }
 0x3ee   : > { %5864 = vmatmul.mubr.msk.f32.vlgmr.msra.gmra.mrb[32].mxu1 %vm873_vm4, %v7323_v21  ;;  %5924 = vmatmul.mubr.msk.f32.vlgmr.msra.gmra.mrb[40].mxu0 %vm873_vm4, %v7344_v6 }
 0x3ef   : > { %6211 = vmatpush3.bf16.msra.mxu1 %v6208_v37  ;;  %5866 = vmatprep.mubr.msk.f32.mxu1 %vm873_vm4, %v7344_v6 }
 0x3f0   : > { %5926 = vmatprep.mubr.msk.f32.mxu0 %vm873_vm4, %v7364_v59  ;;  %6213 = vmatprep.subr.bf16.mxu1 %v6212_v55 }
 0x3f2   : > { %5867 = vmatmul.mubr.msk.f32.gmra.mrb[34].mxu1 %vm873_vm4, %v7364_v59  ;;  %5927 = vmatmul.mubr.msk.f32.gmra.mrb[42].mxu0 %vm873_vm4, %v7378_v16 }
 0x3f3   : > { %5869 = vmatprep.mubr.msk.f32.mxu1 %vm873_vm4, %v7378_v16  ;;  %5929 = vmatprep.mubr.msk.f32.mxu0 %vm873_vm4, %v7384_v26 }
 0x3f4   : > { %6215 = vmatpush3.bf16.msra.mxu1 %v6212_v55 }
 0x3f5   : > { %6230 = vmatprep.subr.bf16.mxu1 %v6412_v60 }
 0x3f6   : > { %5870 = vmatmul.mubr.msk.f32.gmra.mrb[36].mxu1 %vm873_vm4, %v7384_v26  ;;  %5930 = vmatmul.mubr.msk.f32.gmra.mrb[44].mxu0 %vm873_vm4, %v7400_v28 }
 0x3f7   : > { %5872 = vmatprep.mubr.msk.f32.mxu1 %vm873_vm4, %v7400_v28  ;;  %5932 = vmatprep.mubr.msk.f32.mxu0 %vm873_vm4, %v6748_v49 }
 0x3fa   : > { %5873 = vmatmul.mubr.msk.f32.gmra.mrb[38].mxu1 %vm873_vm4, %v6748_v49  ;;  %5933 = vmatmul.mubr.msk.f32.gmra.mrb[46].mxu0 %vm873_vm4, %v6748_v49  ;;  %v4193_v49 = vld [vmem:[%s7705_s10] sm:$0xff] }
 0x3fb   : > { %5903 = vmatprep.mubr.msk.f32.mxu1 %vm873_vm4, %v7311_v1  ;;  %v6225_v62 = vpack.c.bf16 %v4194_v58, %v4193_v49  ;;  %v4196_v1 = vld [vmem:[%s7705_s10 + $0x18] sm:$0xff]  ;;  %5943 = vmatprep.mubr.msk.f32.mxu0 %vm6413_vm5, %v6411_v17 }
 0x3fd   : > { %6226 = vmatpush3.bf16.msra.mxu0 %v6225_v62 }
 0x3fe   : > { %5904 = vmatmul.mubr.msk.f32.vlgmr.msra.gmra.mrb[40].mxu1 %vm873_vm4, %v7341_v5  ;;  %6227 = vmatprep.subr.bf16.mxu0 %v6412_v60 }
 0x3ff   : > { %5906 = vmatprep.mubr.msk.f32.mxu1 %vm873_vm4, %v7347_v13 }
 0x402   : > { %5907 = vmatmul.mubr.msk.f32.gmra.mrb[42].mxu1 %vm873_vm4, %v7375_v15 }
 0x403   : > { %5909 = vmatprep.mubr.msk.f32.mxu1 %vm873_vm4, %v7381_v19 }
 0x406   : > { %5910 = vmatmul.mubr.msk.f32.gmra.mrb[44].mxu1 %vm873_vm4, %v7396_v27 }
 0x407   : > { %5912 = vmatprep.mubr.msk.f32.mxu1 %vm873_vm4, %v6656_v18 }
 0x40a   : > { %5913 = vmatmul.mubr.msk.f32.gmra.mrb[46].mxu1 %vm873_vm4, %v6656_v18  ;;  %v4195_v18 = vld [vmem:[%s7705_s10 + $0x10] sm:$0xff] }
 0x40b   : > { %v6228_v2 = vpack.c.bf16 %v4196_v1, %v4195_v18  ;;  %5959 = vmatprep.mubr.msk.f32.mxu1 %vm6413_vm5, %v6411_v17 }
 0x40d   : > { %6229 = vmatpush3.bf16.msra.mxu0 %v6228_v2 }
 0x40e   : > { %5946 = vmatprep.subr.mxu0 %v6411_v17 }
 0x491   : > { %v5765_v3 = vpop.f32.mrb[8].mxu1  ;;  %v5805_v7 = vpop.f32.mrb[16].mxu0 }
 0x492   : > { %v3278_v9 = vpop.f32.mrb[9].mxu1  ;;  %v3527_v21 = vpop.f32.mrb[17].mxu0 }
 0x495   : > { %v5768_v22 = vpop.f32.mrb[10].mxu1  ;;  %v5808_v47 = vpop.f32.mrb[18].mxu0 }
 0x496   : > { %v3287_v35 = vpop.f32.mrb[11].mxu1  ;;  %v3536_v36 = vpop.f32.mrb[19].mxu0 }
 0x499   : > { %v5771_v51 = vpop.f32.mrb[12].mxu1  ;;  %v5811_v53 = vpop.f32.mrb[20].mxu0 }
 0x49a   : > { %v3295_v56 = vpop.f32.mrb[13].mxu1  ;;  %v3544_v63 = vpop.f32.mrb[21].mxu0 }
 0x49b   : > { %v4996_v63 = vld [vmem:[%s7704_s9] ss:$0 sm:$0xff] }
 0x49d   : > { %v5774_v4 = vpop.f32.mrb[14].mxu1  ;;  %v5814_v5 = vpop.f32.mrb[22].mxu0 }
 0x49e   : > { %v3303_v6 = vpop.f32.mrb[15].mxu1  ;;  %v3552_v13 = vpop.f32.mrb[23].mxu0 }
 0x4a1   : > { %v5785_v14 = vpop.f32.mrb[16].mxu1  ;;  %v5845_v20 = vpop.f32.mrb[24].mxu0 }
 0x4a2   : > { %v3392_v48 = vpop.f32.mrb[17].mxu1  ;;  %v3735_v59 = vpop.f32.mrb[25].mxu0 }
 0x4a3   : > { %v3393_v61 = vadd.f32 %v3392_v48, %v3278_v9 }
 0x4a5   : > { %v5788_v0 = vpop.f32.mrb[18].mxu1  ;;  %v5848_v8 = vpop.f32.mrb[26].mxu0  ;;  %v3559_v10 = vadd.f32 %v3527_v21, %v3393_v61 }
 0x4a6   : > { %v3401_v11 = vpop.f32.mrb[19].mxu1  ;;  %v3744_v12 = vpop.f32.mrb[27].mxu0  ;;  %v4197_v0 = vld [vmem:[%s7706_s11] sm:$0x1] }
 0x4a9   : > { %v5791_v15 = vpop.f32.mrb[20].mxu1  ;;  %v5851_v16 = vpop.f32.mrb[28].mxu0 }
 0x4aa   : > { %v3409_v19 = vpop.f32.mrb[21].mxu1  ;;  %v3752_v26 = vpop.f32.mrb[29].mxu0 }
 0x4ad   : > { %v5794_v27 = vpop.f32.mrb[22].mxu1  ;;  %v5854_v28 = vpop.f32.mrb[30].mxu0 }
 0x4ae   : > { %v3417_v29 = vpop.f32.mrb[23].mxu1  ;;  %v3760_v30 = vpop.f32.mrb[31].mxu0  ;;  %v4292_v28 = vld [vmem:[%s7709_s14] sm:$0xff] }
 0x4af   : > { %v4293_v29 = vld [vmem:[%s7709_s14 + $0x8] sm:$0xff]  ;;  %v4294_v30 = vld [vmem:[%s7709_s14 + $0x10] sm:$0xff] }
 0x4b1   : > { %v5825_v31 = vpop.f32.mrb[24].mxu1  ;;  %v5885_v32 = vpop.f32.mrb[32].mxu0 }
 0x4b2   : > { %v3631_v33 = vpop.f32.mrb[25].mxu1  ;;  %v3943_v24 = vpop.f32.mrb[33].mxu0  ;;  %v6231_v31 = vpack.c.bf16 %v4293_v29, %v4292_v28  ;;  %v4295_v32 = vld [vmem:[%s7709_s14 + $0x18] sm:$0xff] }
 0x4b3   : > { %v3663_v39 = vadd.f32 %v3631_v33, %v3559_v10  ;;  %v4296_v33 = vld [vmem:[%s7710_s15] sm:$0xf] }
 0x4b4   : > { %6232 = vmatpush3.bf16.msra.mxu1 %v6231_v31 }
 0x4b5   : > { %v5828_v40 = vpop.f32.mrb[26].mxu1  ;;  %v5888_v41 = vpop.f32.mrb[34].mxu0  ;;  %v3767_v42 = vadd.f32 %v3735_v59, %v3663_v39  ;;  %v6234_v39 = vpack.c.bf16 %v4295_v32, %v4294_v30  ;;  %6233 = vmatprep.subr.bf16.mxu1 %v6412_v60 }
 0x4b6   : > { %v3640_v43 = vpop.f32.mrb[27].mxu1  ;;  %v3952_v44 = vpop.f32.mrb[35].mxu0  ;;  %v4450_v40 = vld [vmem:[%s7712_s17] sm:$0xff]  ;;  %v4451_v41 = vld [vmem:[%s7712_s17 + $0x8] sm:$0xff] }
 0x4b7   : > { %v6237_v43 = vpack.c.bf16 %v4451_v41, %v4450_v40  ;;  %v4453_v44 = vld [vmem:[%s7712_s17 + $0x18] sm:$0xff] }
 0x4b8   : > { %6235 = vmatpush3.bf16.msra.mxu1 %v6234_v39 }
 0x4b9   : > { %v5831_v45 = vpop.f32.mrb[28].mxu1  ;;  %v5891_v46 = vpop.f32.mrb[36].mxu0  ;;  %6248 = vmatprep.subr.bf16.mxu1 %v6412_v60 }
 0x4ba   : > { %v3648_v25 = vpop.f32.mrb[29].mxu1  ;;  %v3960_v50 = vpop.f32.mrb[37].mxu0 }
 0x4bd   : > { %v5834_v52 = vpop.f32.mrb[30].mxu1  ;;  %v5894_v23 = vpop.f32.mrb[38].mxu0 }
 0x4be   : > { %v3656_v54 = vpop.f32.mrb[31].mxu1  ;;  %v3968_v38 = vpop.f32.mrb[39].mxu0  ;;  %v4286_v23 = vld [vmem:[%s7707_s12] sm:$0x1] }
 0x4bf   : > { %v4288_v38 = vld [vmem:[%s7708_s13] sm:$0x1] }
 0x4c1   : > { %v5865_v37 = vpop.f32.mrb[32].mxu1  ;;  %v5925_v34 = vpop.f32.mrb[40].mxu0 }
 0x4c2   : > { %v3839_v57 = vpop.f32.mrb[33].mxu1  ;;  %v4151_v55 = vpop.f32.mrb[41].mxu0 }
 0x4c3   : > { %v3871_v49 = vadd.f32 %v3839_v57, %v3767_v42  ;;  %v4452_v42 = vld [vmem:[%s7712_s17 + $0x10] sm:$0xff] }
 0x4c4   : > { %v6240_v45 = vpack.c.bf16 %v4453_v44, %v4452_v42 }
 0x4c5   : > { %v5868_v58 = vpop.f32.mrb[34].mxu1  ;;  %v5928_v62 = vpop.f32.mrb[42].mxu0  ;;  %v3975_v18 = vadd.f32 %v3943_v24, %v3871_v49  ;;  %v4291_v24 = vld [vmem:[%s663_s5] sm:$0x1]  ;;  %s666_s5 = scalar_lea.vmem %s7716_s21, %s7733_s25 }
 0x4c6   : > { %v3848_v1 = vpop.f32.mrb[35].mxu1  ;;  %v4160_v2 = vpop.f32.mrb[43].mxu0  ;;  %v4454_v58 = vld [vmem:[%s7712_s17 + $0x20] sm:$0xff]  ;;  %v4455_v62 = vld [vmem:[%s7712_s17 + $0x28] sm:$0xff] }
 0x4c7   : > { %v4456_v1 = vld [vmem:[%s7712_s17 + $0x30] sm:$0xff] }
 0x4c9   : > { %v5871_v3 = vpop.f32.mrb[36].mxu1  ;;  %v5931_v7 = vpop.f32.mrb[44].mxu0 }
 0x4ca   : > { %v3856_v9 = vpop.f32.mrb[37].mxu1  ;;  %v4168_v21 = vpop.f32.mrb[45].mxu0  ;;  %v4534_v3 = vld [vmem:[%s7714_s19] sm:$0xff]  ;;  %v4535_v7 = vld [vmem:[%s7714_s19 + $0x8] sm:$0xff] }
 0x4cb   : > { %v4536_v9 = vld [vmem:[%s7714_s19 + $0x10] sm:$0xff]  ;;  %v6249_v21 = vpack.c.bf16 %v4535_v7, %v4534_v3 }
 0x4cd   : > { %v5874_v22 = vpop.f32.mrb[38].mxu1  ;;  %v5934_v47 = vpop.f32.mrb[46].mxu0 }
 0x4ce   : > { %v3864_v35 = vpop.f32.mrb[39].mxu1  ;;  %v4176_v36 = vpop.f32.mrb[47].mxu0  ;;  %v4537_v22 = vld [vmem:[%s7714_s19 + $0x18] sm:$0xff] }
 0x4cf   : > { %v6252_v47 = vpack.c.bf16 %v4537_v22, %v4536_v9  ;;  %v4538_v35 = vld [vmem:[%s7714_s19 + $0x20] sm:$0xff]  ;;  %v4539_v36 = vld [vmem:[%s7714_s19 + $0x28] sm:$0xff] }
 0x4d1   : > { %v5905_v51 = vpop.f32.mrb[40].mxu1 }
 0x4d2   : > { %v4047_v53 = vpop.f32.mrb[41].mxu1  ;;  %v6255_v51 = vpack.c.bf16 %v4539_v36, %v4538_v35 }
 0x4d3   : > { %v4079_v56 = vadd.f32 %v4047_v53, %v3975_v18  ;;  %v6243_v18 = vpack.c.bf16 %v4455_v62, %v4454_v58 }
 0x4d5   : > { %v4183_v4 = vadd.f32 %v4151_v55, %v4079_v56  ;;  %v5908_v5 = vpop.f32.mrb[42].mxu1  ;;  %v4447_v56 = vld [vmem:[%s7711_s16] sm:$0x1] }
 0x4d6   : > { %v4056_v6 = vpop.f32.mrb[43].mxu1 }
 0x4d7   : > { %v4191_v13 = vadd.f32 %v4996_v63, %v4183_v4 }
 0x4d9   : > { %v4192_v14 = vmax.f32 %v4191_v13, 0.0  ;;  %v5911_v20 = vpop.f32.mrb[44].mxu1  ;;  %v4540_v13 = vld [vmem:[%s7714_s19 + $0x30] sm:$0xff] }
 0x4da   : > { %v4064_v48 = vpop.f32.mrb[45].mxu1  ;;  %v4458_v20 = vld [vmem:[%s7713_s18] sm:$0x1] }
 0x4db   : > { %5944 = vmatmul.mubr.msk.f32.vlgmr.msra.gmra.mrb[48].mxu0 %vm873_vm4, %v4192_v14 }
 0x4dc   : > { %5948 = vmatprep.mubr.msk.f32.mxu0 %vm6413_vm5, %v6411_v17  ;;  %5947 = vmatpush3.msk.msra.mxu0 %vm720_vm0, %v4296_v33 }
 0x4dd   : > { %v5914_v59 = vpop.f32.mrb[46].mxu1  ;;  %6236 = vmatprep.subr.bf16.mxu0 %v6412_v60 }
 0x4de   : > { %v4072_v61 = vpop.f32.mrb[47].mxu1 }
 0x4df   : > { %5949 = vmatmul.mubr.msk.f32.vlgmr.msra.gmra.mrb[50].mxu0 %vm4297_vm7, %v4291_v24 }
 0x4e0   : > { %5978 = vmatprep.mubr.msk.f32.mxu0 %vm6413_vm5, %v6411_v17  ;;  %6238 = vmatpush3.bf16.msra.mxu0 %v6237_v43 }
 0x4e1   : > { %6239 = vmatprep.subr.bf16.mxu0 %v6412_v60 }
 0x4e4   : > { %6241 = vmatpush3.bf16.msra.mxu0 %v6240_v45 }
 0x4e5   : > { %6242 = vmatprep.subr.bf16.mxu0 %v6412_v60 }
 0x4e8   : > { %6244 = vmatpush3.bf16.msra.mxu0 %v6243_v18 }
 0x4e9   : > { %6245 = vmatprep.subr.bf16.mxu0 %v6412_v60 }
 0x5ae   : > { %v4267_v8 = vpop.f32.mrb[48].mxu0 }
 0x5af   : > { %v4268_v10 = vadd.f32 %v4267_v8, %v4197_v0  ;;  %v5945_v11 = vpop.f32.mrb[49].mxu0  ;;  %v4542_v8 = vld [vmem:[%s7715_s20] sm:$0x1] }
 0x5b1   : > { %v4272_v12 = vsel %vm4271_vm6, %v4268_v10, 0.0 }
 0x5b2   : > { %4273 = vadd.xlane.f32.xlu0 %v4272_v12  ;;  %v4370_v55 = vpop.f32.mrb[50].mxu0 }
 0x5b3   : > { %v5950_v49 = vpop.f32.mrb[51].mxu0 }
 0x63f   : > { %v4274_v15 = vpop.xlane.xlu0 %4273 }
 0x640   : > { %v4276_v16 = vmul.f32 0.03125, %v4274_v15 }
 0x642   : > { %v4277_v19 = vsub.f32 %v4268_v10, %v4276_v16 }
 0x644   : > { %v4278_v26 = vmul.f32 %v4277_v19, %v4277_v19 }
 0x646   : > { %v4279_v27 = vsel %vm4271_vm6, %v4278_v26, 0.0 }
 0x647   : > { %4280 = vadd.xlane.f32.xlu0 %v4279_v27 }
 0x6d4   : > { %v4281_v46 = vpop.xlane.xlu0 %4280 }
 0x6d5   : > { %v4282_v25 = vmul.f32 0.03125, %v4281_v46 }
 0x6d7   : > { %v4283_v50 = vadd.f32 1e-05, %v4282_v25 }
 0x6d9   : > { %6399 = vrsqrt.f32 %v4283_v50 }
 0x6e3   : > { %v6400_v52 = vpop.eup %6399 }
 0x6e4   : > { %v4285_v54 = vmul.f32 %v6400_v52, %v4277_v19 }
 0x6e6   : > { %v4287_v37 = vmul.f32 %v4286_v23, %v4285_v54 }
 0x6e8   : > { %v4289_v34 = vadd.f32 %v4288_v38, %v4287_v37 }
 0x6ea   : > { %6401 = vtanh.f32 %v4289_v34 }
 0x6f4   : > { %v6402_v57 = vpop.eup %6401 }
 0x6f5   : > { %5960 = vmatmul.mubr.msk.f32.vlgmr.msra.gmra.mrb[48].mxu1 %vm873_vm4, %v6402_v57 }
 0x6f6   : > { %5997 = vmatprep.mubr.msk.f32.mxu1 %vm6413_vm5, %v6411_v17  ;;  %v4457_v17 = vld [vmem:[%s7712_s17 + $0x38] sm:$0xff]  ;;  %6250 = vmatpush3.bf16.msra.mxu1 %v6249_v21 }
 0x6f7   : > { %v6246_v2 = vpack.c.bf16 %v4457_v17, %v4456_v1  ;;  %6251 = vmatprep.subr.bf16.mxu1 %v6412_v60 }
 0x6f9   : > { %6247 = vmatpush3.bf16.msra.mxu0 %v6246_v2 }
 0x6fa   : > { %6253 = vmatpush3.bf16.msra.mxu1 %v6252_v47 }
 0x6fb   : > { %6254 = vmatprep.subr.bf16.mxu1 %v6412_v60 }
 0x6fe   : > { %6256 = vmatpush3.bf16.msra.mxu1 %v6255_v51 }
 0x6ff   : > { %6257 = vmatprep.subr.bf16.mxu1 %v6412_v60  ;;  %v4541_v60 = vld [vmem:[%s7714_s19 + $0x38] sm:$0xff] }
 0x700   : > { %v6258_v14 = vpack.c.bf16 %v4541_v60, %v4540_v13 }
 0x702   : > { %6259 = vmatpush3.bf16.msra.mxu1 %v6258_v14 }
 0x7c8   : > { %v4443_v53 = vpop.f32.mrb[48].mxu1 }
 0x7c9   : > { %v4444_v63 = vadd.f32 %v4443_v53, %v4370_v55  ;;  %v5961_v4 = vpop.f32.mrb[49].mxu1 }
 0x7cb   : > { %v4448_v5 = vadd.f32 %v4447_v56, %v4444_v63 }
 0x7cd   : > { %v4449_v6 = vmax.f32 %v4448_v5, 0.0 }
 0x7cf   : > { %5979 = vmatmul.mubr.msk.f32.vlgmr.msra.gmra.mrb[52].mxu0 %vm4459_vm8, %v4449_v6 }
 0x8a2   : > { %v4529_v48 = vpop.f32.mrb[52].mxu0 }
 0x8a3   : > { %v4530_v59 = vadd.f32 %v4529_v48, %v4458_v20  ;;  %v5980_v61 = vpop.f32.mrb[53].mxu0 }
 0x8a5   : > { %v4533_v0 = vmax.f32 %v4530_v59, 0.0 }
 0x8a7   : > { %5998 = vmatmul.mubr.msk.f32.vlgmr.msra.gmra.mrb[50].mxu1 %vm4459_vm8, %v4533_v0 }
 0x97a   : > { %v4612_v10 = vpop.f32.mrb[50].mxu1 }
 0x97b   : > { %v4613_v11 = vadd.f32 %v4612_v10, %v4542_v8  ;;  %v5999_v12 = vpop.f32.mrb[51].mxu1 }
 0x97d   : > { %4617 = vst.msk [vmem:[%s666_s5] sm:$0x1] %vm4616_vm9, %v4613_v11 }
 0x97e PF: > { %s31_s2 = sadd.s32 1, %s6409_s2  }
 0x97f   : > { %p28_p4 = scmp.ge.s32.totalorder %s31_s2, 4  }
 0x981   :  { %30 = sbr.rel (!%p28_p4) target bundleno = 7 (0x7), region = 161 }

</bundles_post_ra>
